<compile_context>
chip_gen: v6e
topology: v6e:2x2x1
jax: 0.10.0
libtpu: 0.0.40
codegen_flags: <defaults>
</compile_context>

<pallas_src>
import functools

import jax
import jax.numpy as jnp
import numpy as np
from jax.experimental import pallas as pl
from jax.experimental.pallas import tpu as pltpu


def _lrelu(v):
    # LeakyReLU(0.2) == max(x, 0.2*x) for a slope in (0, 1).
    return jnp.maximum(v, 0.2 * v)


def dqn_kernel(x_ref, w1_ref, b1_ref, w2_ref, b2_ref,
               fc1w_ref, fc1b_ref, fc2w_ref, fc2b_ref, fc3w_ref, fc3b_ref,
               out_ref):
    """Every layer is a (features, K) @ (K, batch) MXU dot; batch on lanes."""
    x = x_ref[...]                                               # (C*121, bt)
    a1 = _lrelu(jnp.dot(w1_ref[...], x,
                        preferred_element_type=jnp.float32) + b1_ref[...])
    c2 = _lrelu(jnp.dot(w2_ref[...], a1,
                        preferred_element_type=jnp.float32) + b2_ref[...])
    h1 = _lrelu(jnp.dot(fc1w_ref[...], c2,
                        preferred_element_type=jnp.float32) + fc1b_ref[...])
    h2 = _lrelu(jnp.dot(fc2w_ref[...], h1,
                        preferred_element_type=jnp.float32) + fc2b_ref[...])
    logits = jnp.dot(fc3w_ref[...], h2,
                     preferred_element_type=jnp.float32) + fc3b_ref[...]

    # Softmax over the feature (sublane) axis; lane-dense (out_size, bt) store.
    m = jnp.max(logits, axis=0, keepdims=True)
    e = jnp.exp(logits - m)
    denom = jnp.sum(e, axis=0, keepdims=True)                    # (1, bt)
    # Exact reciprocal: kernel is MXU-bound so the divide is free; approx=True
    # would only risk the 1e-4 validation tolerance.
    out_ref[...] = e * pl.reciprocal(denom, approx=False)


def _conv1_matrix(w1, b1, in_channels):
    """conv1 (2,C,3,3) as a (162, C*121) Toeplitz matrix.

    Flat layouts used by the kernel:
      x  rows: c*121 + h*11 + w      (h, w in [0, 11))
      a1 rows: o*81  + h*9  + w      (h, w in [0, 9))
    """
    C = in_channels
    o, h, w, c, ky, kx = np.meshgrid(np.arange(2), np.arange(9), np.arange(9),
                                     np.arange(C), np.arange(3), np.arange(3),
                                     indexing="ij")
    rows = (o * 81 + h * 9 + w).ravel()
    cols = (c * 121 + (h + ky) * 11 + (w + kx)).ravel()
    vals = w1[o.ravel(), c.ravel(), ky.ravel(), kx.ravel()].astype(jnp.float32)
    w1m = jnp.zeros((162, C * 121), jnp.float32).at[rows, cols].set(vals)
    b1v = jnp.repeat(b1.astype(jnp.float32), 81).reshape(162, 1)
    return w1m, b1v


def _conv2_matrix(w2, b2):
    """conv2 (1,2,3,3) as a (49, 162) Toeplitz matrix.

    c2 rows: h*7 + w (PyTorch flatten order of the (1,7,7) map); a1 columns
    follow the layout produced by _conv1_matrix.
    """
    c, h, w, ky, kx = np.meshgrid(np.arange(2), np.arange(7), np.arange(7),
                                  np.arange(3), np.arange(3), indexing="ij")
    rows = (h * 7 + w).ravel()
    cols = (c * 81 + (h + ky) * 9 + (w + kx)).ravel()
    vals = w2[0, c.ravel(), ky.ravel(), kx.ravel()].astype(jnp.float32)
    w2m = jnp.zeros((49, 162), jnp.float32).at[rows, cols].set(vals)
    b2v = jnp.full((49, 1), b2[0], jnp.float32)
    return w2m, b2v


def _round_up(n, m):
    return ((n + m - 1) // m) * m


def _choose_batch_tile(bp):
    """bp is a positive multiple of 128.  Pick the largest lane tile (<= 512)
    that divides bp while keeping >= 2 grid steps whenever bp allows, so the
    'parallel' grid axis can feed both v7x TensorCores; on 1-TC chips (v5e/v6e)
    the bigger tile simply amortizes the ~0.35us per-grid-step overhead and
    keeps MXU passes full (multiples of 256 preferred there too)."""
    if bp <= 128:
        return bp
    for bt in (512, 384, 256, 128):
        if bp % bt == 0 and bp // bt >= 2:
            return bt
    return 128


def dqn_forward(x, params):
    """x: (B, C, 11, 11) float32 NCHW. Returns softmax probs (B, output_size)."""
    w1, b1, w2, b2, fc1w, fc1b, fc2w, fc2b, fc3w, fc3b = params
    B, C, H, W = x.shape
    assert (H, W) == (11, 11), "fc1 = Linear(49, 24) implies an 11x11 input"
    out_size = fc3w.shape[1]

    bp = _round_up(B, 128)
    bt = _choose_batch_tile(bp)

    # Layout plumbing only (one cheap XLA pass): batch to the lane axis.
    # For very large B the producer should emit the (C*H*W, B) layout directly.
    xt = jnp.transpose(x.astype(jnp.float32), (1, 2, 3, 0)).reshape(C * H * W, B)
    if bp != B:
        xt = jnp.pad(xt, ((0, 0), (0, bp - B)))   # zero lanes -> finite, sliced off

    w1m, b1v = _conv1_matrix(w1, b1, C)            # (162, C*121), (162, 1)
    w2m, b2v = _conv2_matrix(w2, b2)               # (49, 162),    (49, 1)

    vmem = functools.partial(pl.BlockSpec, memory_space=pltpu.MemorySpace.VMEM)

    out = pl.pallas_call(
        dqn_kernel,
        out_shape=jax.ShapeDtypeStruct((out_size, bp), jnp.float32),
        grid=(bp // bt,),
        in_specs=[
            pl.BlockSpec((C * H * W, bt), lambda i: (0, i)),   # x: batch-tiled
            vmem(), vmem(),        # conv1 Toeplitz weight (162, C*121) + bias
            vmem(), vmem(),        # conv2 Toeplitz weight (49, 162)    + bias
            vmem(), vmem(),        # fc1 (24, 49),  (24, 1)
            vmem(), vmem(),        # fc2 (24, 24),  (24, 1)
            vmem(), vmem(),        # fc3 (out, 24), (out, 1)
        ],
        out_specs=pl.BlockSpec((out_size, bt), lambda i: (0, i)),
        compiler_params=pltpu.CompilerParams(
            dimension_semantics=("parallel",)),
    )(xt,
      w1m, b1v, w2m, b2v,
      fc1w.T, fc1b.reshape(-1, 1),
      fc2w.T, fc2b.reshape(-1, 1),
      fc3w.T, fc3b.reshape(-1, 1))

    return out.T[:B]                               # back to (B, out_size)


def dqn_reference(x, params):
    """Pure-JAX reference mirroring the PyTorch forward (for verification)."""
    w1, b1, w2, b2, fc1w, fc1b, fc2w, fc2b, fc3w, fc3b = params

    def lrelu(v):
        return jnp.where(v >= 0, v, 0.2 * v)

    y = jax.lax.conv_general_dilated(
        x, w1, (1, 1), 'VALID',
        dimension_numbers=('NCHW', 'OIHW', 'NCHW')) + b1.reshape(1, -1, 1, 1)
    y = lrelu(y)
    y = jax.lax.conv_general_dilated(
        y, w2, (1, 1), 'VALID',
        dimension_numbers=('NCHW', 'OIHW', 'NCHW')) + b2.reshape(1, -1, 1, 1)
    y = lrelu(y.reshape(y.shape[0], -1))
    h1 = lrelu(y @ fc1w + fc1b)
    h2 = lrelu(h1 @ fc2w + fc2b)
    logits = h2 @ fc3w + fc3b
    return jax.nn.softmax(logits, axis=-1)


def init_params(key, in_channels, output_size):
    """Deterministic synthetic init (shapes match DQN.__init__). fc weights are
    stored as (in_features, out_features), i.e. PyTorch weight transposed."""
    ks = jax.random.split(key, 10)
    s = 0.2
    w1 = s * jax.random.normal(ks[0], (2, in_channels, 3, 3), jnp.float32)
    b1 = s * jax.random.normal(ks[1], (2,), jnp.float32)
    w2 = s * jax.random.normal(ks[2], (1, 2, 3, 3), jnp.float32)
    b2 = s * jax.random.normal(ks[3], (1,), jnp.float32)
    fc1w = s * jax.random.normal(ks[4], (49, 24), jnp.float32)
    fc1b = s * jax.random.normal(ks[5], (24,), jnp.float32)
    fc2w = s * jax.random.normal(ks[6], (24, 24), jnp.float32)
    fc2b = s * jax.random.normal(ks[7], (24,), jnp.float32)
    fc3w = s * jax.random.normal(ks[8], (24, output_size), jnp.float32)
    fc3b = s * jax.random.normal(ks[9], (output_size,), jnp.float32)
    return (w1, b1, w2, b2, fc1w, fc1b, fc2w, fc2b, fc3w, fc3b)


if __name__ == "__main__":
    # Small deterministic example.  11x11 spatial is fixed by fc1 = Linear(49,.).
    # B=4 (< 128) also exercises the lane-padding path.
    B, C, H, W = 4, 4, 11, 11
    output_size = 6

    key = jax.random.PRNGKey(0)
    kx, kp = jax.random.split(key)
    x = jax.random.normal(kx, (B, C, H, W), jnp.float32)
    params = init_params(kp, C, output_size)

    out = jax.block_until_ready(dqn_forward(x, params))
    ref = jax.block_until_ready(dqn_reference(x, params))

    assert out.shape == (B, output_size)
    np.testing.assert_allclose(np.asarray(out), np.asarray(ref),
                               rtol=1e-4, atol=1e-5)
    print("KERNEL_OK")
</pallas_src>

<mosaic_0001>
module attributes {stable_mosaic.version = 11 : i64} {
  func.func @dqn_kernel(%arg0: i32, %arg1: memref<484x128xf32, #tpu.memory_space<vmem>>, %arg2: memref<162x484xf32, #tpu.memory_space<vmem>>, %arg3: memref<162x1xf32, #tpu.memory_space<vmem>>, %arg4: memref<49x162xf32, #tpu.memory_space<vmem>>, %arg5: memref<49x1xf32, #tpu.memory_space<vmem>>, %arg6: memref<24x49xf32, #tpu.memory_space<vmem>>, %arg7: memref<24x1xf32, #tpu.memory_space<vmem>>, %arg8: memref<24x24xf32, #tpu.memory_space<vmem>>, %arg9: memref<24x1xf32, #tpu.memory_space<vmem>>, %arg10: memref<6x24xf32, #tpu.memory_space<vmem>>, %arg11: memref<6x1xf32, #tpu.memory_space<vmem>>, %arg12: memref<6x128xf32, #tpu.memory_space<vmem>>) attributes {dimension_semantics = [#tpu.dimension_semantics<parallel>], iteration_bounds = array<i64: 1>, scalar_prefetch = 0 : i64, scratch_operands = 0 : i64, tpu.core_type = #tpu.core_type<tc>, window_params = [{transform_indices = @transform_0, window_bounds = array<i64: 484, 128>}, {pipeline_mode = #tpu.pipeline_mode<synchronous>, transform_indices = @transform_1, window_bounds = array<i64: 162, 484>}, {pipeline_mode = #tpu.pipeline_mode<synchronous>, transform_indices = @transform_2, window_bounds = array<i64: 162, 1>}, {pipeline_mode = #tpu.pipeline_mode<synchronous>, transform_indices = @transform_3, window_bounds = array<i64: 49, 162>}, {pipeline_mode = #tpu.pipeline_mode<synchronous>, transform_indices = @transform_4, window_bounds = array<i64: 49, 1>}, {pipeline_mode = #tpu.pipeline_mode<synchronous>, transform_indices = @transform_5, window_bounds = array<i64: 24, 49>}, {pipeline_mode = #tpu.pipeline_mode<synchronous>, transform_indices = @transform_6, window_bounds = array<i64: 24, 1>}, {pipeline_mode = #tpu.pipeline_mode<synchronous>, transform_indices = @transform_7, window_bounds = array<i64: 24, 24>}, {pipeline_mode = #tpu.pipeline_mode<synchronous>, transform_indices = @transform_8, window_bounds = array<i64: 24, 1>}, {pipeline_mode = #tpu.pipeline_mode<synchronous>, transform_indices = @transform_9, window_bounds = array<i64: 6, 24>}, {pipeline_mode = #tpu.pipeline_mode<synchronous>, transform_indices = @transform_10, window_bounds = array<i64: 6, 1>}, {transform_indices = @transform_11, window_bounds = array<i64: 6, 128>}]} {
    %c0 = arith.constant 0 : index
    %c0_0 = arith.constant 0 : index
    %0 = vector.load %arg1[%c0, %c0_0] : memref<484x128xf32, #tpu.memory_space<vmem>>, vector<484x128xf32>
    %c0_1 = arith.constant 0 : index
    %c0_2 = arith.constant 0 : index
    %1 = vector.load %arg2[%c0_1, %c0_2] : memref<162x484xf32, #tpu.memory_space<vmem>>, vector<162x484xf32>
    %cst = arith.constant dense<0.000000e+00> : vector<162x128xf32>
    %2 = tpu.matmul %1, %0, %cst {dimension_numbers = #tpu.dot_dimension_numbers<[1], [0], [0], [1], [0, 0, 1, 1], [], []>} : vector<162x484xf32>, vector<484x128xf32>, vector<162x128xf32> -> vector<162x128xf32>
    %c0_3 = arith.constant 0 : index
    %c0_4 = arith.constant 0 : index
    %3 = vector.load %arg3[%c0_3, %c0_4] : memref<162x1xf32, #tpu.memory_space<vmem>>, vector<162x1xf32>
    %4 = vector.broadcast %3 : vector<162x1xf32> to vector<162x128xf32>
    %5 = arith.addf %2, %4 : vector<162x128xf32>
    %cst_5 = arith.constant 2.000000e-01 : f32
    %6 = vector.broadcast %cst_5 : f32 to vector<162x128xf32>
    %7 = arith.mulf %6, %5 : vector<162x128xf32>
    %8 = arith.maximumf %5, %7 : vector<162x128xf32>
    %c0_6 = arith.constant 0 : index
    %c0_7 = arith.constant 0 : index
    %9 = vector.load %arg4[%c0_6, %c0_7] : memref<49x162xf32, #tpu.memory_space<vmem>>, vector<49x162xf32>
    %cst_8 = arith.constant dense<0.000000e+00> : vector<49x128xf32>
    %10 = tpu.matmul %9, %8, %cst_8 {dimension_numbers = #tpu.dot_dimension_numbers<[1], [0], [0], [1], [0, 0, 1, 1], [], []>} : vector<49x162xf32>, vector<162x128xf32>, vector<49x128xf32> -> vector<49x128xf32>
    %c0_9 = arith.constant 0 : index
    %c0_10 = arith.constant 0 : index
    %11 = vector.load %arg5[%c0_9, %c0_10] : memref<49x1xf32, #tpu.memory_space<vmem>>, vector<49x1xf32>
    %12 = vector.broadcast %11 : vector<49x1xf32> to vector<49x128xf32>
    %13 = arith.addf %10, %12 : vector<49x128xf32>
    %cst_11 = arith.constant 2.000000e-01 : f32
    %14 = vector.broadcast %cst_11 : f32 to vector<49x128xf32>
    %15 = arith.mulf %14, %13 : vector<49x128xf32>
    %16 = arith.maximumf %13, %15 : vector<49x128xf32>
    %c0_12 = arith.constant 0 : index
    %c0_13 = arith.constant 0 : index
    %17 = vector.load %arg6[%c0_12, %c0_13] : memref<24x49xf32, #tpu.memory_space<vmem>>, vector<24x49xf32>
    %cst_14 = arith.constant dense<0.000000e+00> : vector<24x128xf32>
    %18 = tpu.matmul %17, %16, %cst_14 {dimension_numbers = #tpu.dot_dimension_numbers<[1], [0], [0], [1], [0, 0, 1, 1], [], []>} : vector<24x49xf32>, vector<49x128xf32>, vector<24x128xf32> -> vector<24x128xf32>
    %c0_15 = arith.constant 0 : index
    %c0_16 = arith.constant 0 : index
    %19 = vector.load %arg7[%c0_15, %c0_16] : memref<24x1xf32, #tpu.memory_space<vmem>>, vector<24x1xf32>
    %20 = vector.broadcast %19 : vector<24x1xf32> to vector<24x128xf32>
    %21 = arith.addf %18, %20 : vector<24x128xf32>
    %cst_17 = arith.constant 2.000000e-01 : f32
    %22 = vector.broadcast %cst_17 : f32 to vector<24x128xf32>
    %23 = arith.mulf %22, %21 : vector<24x128xf32>
    %24 = arith.maximumf %21, %23 : vector<24x128xf32>
    %c0_18 = arith.constant 0 : index
    %c0_19 = arith.constant 0 : index
    %25 = vector.load %arg8[%c0_18, %c0_19] : memref<24x24xf32, #tpu.memory_space<vmem>>, vector<24x24xf32>
    %cst_20 = arith.constant dense<0.000000e+00> : vector<24x128xf32>
    %26 = tpu.matmul %25, %24, %cst_20 {dimension_numbers = #tpu.dot_dimension_numbers<[1], [0], [0], [1], [0, 0, 1, 1], [], []>} : vector<24x24xf32>, vector<24x128xf32>, vector<24x128xf32> -> vector<24x128xf32>
    %c0_21 = arith.constant 0 : index
    %c0_22 = arith.constant 0 : index
    %27 = vector.load %arg9[%c0_21, %c0_22] : memref<24x1xf32, #tpu.memory_space<vmem>>, vector<24x1xf32>
    %28 = vector.broadcast %27 : vector<24x1xf32> to vector<24x128xf32>
    %29 = arith.addf %26, %28 : vector<24x128xf32>
    %cst_23 = arith.constant 2.000000e-01 : f32
    %30 = vector.broadcast %cst_23 : f32 to vector<24x128xf32>
    %31 = arith.mulf %30, %29 : vector<24x128xf32>
    %32 = arith.maximumf %29, %31 : vector<24x128xf32>
    %c0_24 = arith.constant 0 : index
    %c0_25 = arith.constant 0 : index
    %33 = vector.load %arg10[%c0_24, %c0_25] : memref<6x24xf32, #tpu.memory_space<vmem>>, vector<6x24xf32>
    %cst_26 = arith.constant dense<0.000000e+00> : vector<6x128xf32>
    %34 = tpu.matmul %33, %32, %cst_26 {dimension_numbers = #tpu.dot_dimension_numbers<[1], [0], [0], [1], [0, 0, 1, 1], [], []>} : vector<6x24xf32>, vector<24x128xf32>, vector<6x128xf32> -> vector<6x128xf32>
    %c0_27 = arith.constant 0 : index
    %c0_28 = arith.constant 0 : index
    %35 = vector.load %arg11[%c0_27, %c0_28] : memref<6x1xf32, #tpu.memory_space<vmem>>, vector<6x1xf32>
    %36 = vector.broadcast %35 : vector<6x1xf32> to vector<6x128xf32>
    %37 = arith.addf %34, %36 : vector<6x128xf32>
    %cst_29 = arith.constant dense<0xFF800000> : vector<128xf32>
    %38 = vector.multi_reduction <maximumf>, %37, %cst_29 [0] : vector<6x128xf32> to vector<128xf32>
    %39 = vector.shape_cast %38 : vector<128xf32> to vector<1x128xf32>
    %40 = vector.broadcast %39 : vector<1x128xf32> to vector<6x128xf32>
    %41 = arith.subf %37, %40 : vector<6x128xf32>
    %42 = math.exp %41 : vector<6x128xf32>
    %cst_30 = arith.constant dense<0.000000e+00> : vector<128xf32>
    %43 = vector.multi_reduction <add>, %42, %cst_30 [0] : vector<6x128xf32> to vector<128xf32>
    %44 = vector.shape_cast %43 : vector<128xf32> to vector<1x128xf32>
    %45 = tpu.reciprocal %44 : vector<1x128xf32> -> vector<1x128xf32>
    %46 = vector.broadcast %45 : vector<1x128xf32> to vector<6x128xf32>
    %47 = arith.mulf %42, %46 : vector<6x128xf32>
    %c0_31 = arith.constant 0 : index
    %c0_32 = arith.constant 0 : index
    %48 = vector.load %arg12[%c0_31, %c0_32] : memref<6x128xf32, #tpu.memory_space<vmem>>, vector<6x128xf32>
    tpu.vector_store %arg12[%c0_31, %c0_32], %47 {strides = array<i32>} : memref<6x128xf32, #tpu.memory_space<vmem>>, vector<6x128xf32>,
    return
  }
  func.func @transform_0(%arg0: i32) -> (i32, i32) {
    %c0_i32 = arith.constant 0 : i32
    %c0_i32_0 = arith.constant 0 : i32
    return %c0_i32, %arg0 : i32, i32
  }
  func.func @transform_1(%arg0: i32) -> (i32, i32) {
    %c0_i32 = arith.constant 0 : i32
    %c0_i32_0 = arith.constant 0 : i32
    %c0_i32_1 = arith.constant 0 : i32
    return %c0_i32, %c0_i32_0 : i32, i32
  }
  func.func @transform_2(%arg0: i32) -> (i32, i32) {
    %c0_i32 = arith.constant 0 : i32
    %c0_i32_0 = arith.constant 0 : i32
    %c0_i32_1 = arith.constant 0 : i32
    return %c0_i32, %c0_i32_0 : i32, i32
  }
  func.func @transform_3(%arg0: i32) -> (i32, i32) {
    %c0_i32 = arith.constant 0 : i32
    %c0_i32_0 = arith.constant 0 : i32
    %c0_i32_1 = arith.constant 0 : i32
    return %c0_i32, %c0_i32_0 : i32, i32
  }
  func.func @transform_4(%arg0: i32) -> (i32, i32) {
    %c0_i32 = arith.constant 0 : i32
    %c0_i32_0 = arith.constant 0 : i32
    %c0_i32_1 = arith.constant 0 : i32
    return %c0_i32, %c0_i32_0 : i32, i32
  }
  func.func @transform_5(%arg0: i32) -> (i32, i32) {
    %c0_i32 = arith.constant 0 : i32
    %c0_i32_0 = arith.constant 0 : i32
    %c0_i32_1 = arith.constant 0 : i32
    return %c0_i32, %c0_i32_0 : i32, i32
  }
  func.func @transform_6(%arg0: i32) -> (i32, i32) {
    %c0_i32 = arith.constant 0 : i32
    %c0_i32_0 = arith.constant 0 : i32
    %c0_i32_1 = arith.constant 0 : i32
    return %c0_i32, %c0_i32_0 : i32, i32
  }
  func.func @transform_7(%arg0: i32) -> (i32, i32) {
    %c0_i32 = arith.constant 0 : i32
    %c0_i32_0 = arith.constant 0 : i32
    %c0_i32_1 = arith.constant 0 : i32
    return %c0_i32, %c0_i32_0 : i32, i32
  }
  func.func @transform_8(%arg0: i32) -> (i32, i32) {
    %c0_i32 = arith.constant 0 : i32
    %c0_i32_0 = arith.constant 0 : i32
    %c0_i32_1 = arith.constant 0 : i32
    return %c0_i32, %c0_i32_0 : i32, i32
  }
  func.func @transform_9(%arg0: i32) -> (i32, i32) {
    %c0_i32 = arith.constant 0 : i32
    %c0_i32_0 = arith.constant 0 : i32
    %c0_i32_1 = arith.constant 0 : i32
    return %c0_i32, %c0_i32_0 : i32, i32
  }
  func.func @transform_10(%arg0: i32) -> (i32, i32) {
    %c0_i32 = arith.constant 0 : i32
    %c0_i32_0 = arith.constant 0 : i32
    %c0_i32_1 = arith.constant 0 : i32
    return %c0_i32, %c0_i32_0 : i32, i32
  }
  func.func @transform_11(%arg0: i32) -> (i32, i32) {
    %c0_i32 = arith.constant 0 : i32
    %c0_i32_0 = arith.constant 0 : i32
    return %c0_i32, %arg0 : i32, i32
  }
}

</mosaic_0001>

<bundles_post_ra>
// kernel: tpu_custom_call.1
= control target key start
LH: loop header
LB: loop body
LE: loop exit
PB: predicated region body
PF: predicated region fallthrough
CT: control target
= control target key end

     0   :  { %16 = vsyncpa [#allocation3], 0  ;;  %s2003_s0 = inlined_call_operand.hbm [shape: f32[484,128], index: 0, kind: input, shape index: {}]   ;;  %s2004_s1 = inlined_call_operand.hbm [shape: f32[162,484], index: 1, kind: input, shape index: {}]   ;;  %s2005_s2 = inlined_call_operand.vmem [shape: f32[162,1], index: 2, kind: input, shape index: {}]   ;;  %s2006_s3 = inlined_call_operand.vmem [shape: f32[49,162], index: 3, kind: input, shape index: {}]   ;;  %s2007_s4 = inlined_call_operand.vmem [shape: f32[49,1], index: 4, kind: input, shape index: {}]   ;;  %s2008_s5 = inlined_call_operand.vmem [shape: f32[24,49], index: 5, kind: input, shape index: {}]   ;;  %s2009_s6 = inlined_call_operand.vmem [shape: f32[24,1], index: 6, kind: input, shape index: {}]   ;;  %s2010_s7 = inlined_call_operand.vmem [shape: f32[24,24], index: 7, kind: input, shape index: {}]   ;;  %s2011_s8 = inlined_call_operand.vmem [shape: f32[24,1], index: 8, kind: input, shape index: {}]   ;;  %s2012_s9 = inlined_call_operand.vmem [shape: f32[6,24], index: 9, kind: input, shape index: {}]   ;;  %s2013_s10 = inlined_call_operand.vmem [shape: f32[6,1], index: 10, kind: input, shape index: {}]   ;;  %s2014_s11 = inlined_call_operand.hbm [shape: f32[6,128], index: 11, kind: output, shape index: {}]  }
   0x1   :  { %17 = vsyncpa [#allocation6], 0 }
   0x2   :  { %18 = vsyncpa [#allocation4], 0  ;;  %s1526_s17 = smov [#allocation2]  }
   0x3   :  { %s24_s18 = sshll.u32 %s1526_s17, 4  ;;  %s25_s18 = int_to_ptr.vmem [resolvable:$true] %s24_s18 }
   0x4   :  { %s1468_s19 = scalar_lea.vmem %s25_s18, 7808  ;;  %p1473_p1 = scmp.lt.s32.totalorder %s25_s18, %s25_s18 }
   0x5   :  { %p1469_p0 = scmp.ne.s32.totalorder %s25_s18, %s1468_s19  ;;  %p1474_p2 = scmp.lt.s32.totalorder %s1468_s19, %s1468_s19 }
   0x7   :  { %p1475_p3 = por %p1474_p2, %p1473_p1 }
   0x9   :  { %p1476_p4 = pnand %p1475_p3, %p1469_p0 }
   0xb   :  { %1479 = shalt.err (!%p1476_p4)
}
   0xc   :  { %s1527_s20 = smov 128   ;;  %s1528_s21 = smov 8  }
   0xd   :  { %30 = dma.hbm_to_vmem [thread:$0]  %s2003_s0, 7808, %s25_s18, [#allocation3], %s1527_s20, %s1527_s20, %s1528_s21  }
   0xe   :  { %s1529_s24 = smov [#allocation5]  }
   0xf   :  { %s36_s25 = sshll.u32 %s1529_s24, 4  ;;  %s37_s25 = int_to_ptr.vmem [resolvable:$true] %s36_s25 }
  0x10   :  { %s1488_s26 = scalar_lea.vmem %s37_s25, 10752  ;;  %p1493_p6 = scmp.lt.s32.totalorder %s37_s25, %s37_s25 }
  0x11   :  { %p1489_p5 = scmp.ne.s32.totalorder %s37_s25, %s1488_s26  ;;  %p1494_p7 = scmp.lt.s32.totalorder %s1488_s26, %s1488_s26 }
  0x13   :  { %p1495_p8 = por %p1494_p7, %p1493_p6 }
  0x15   :  { %p1496_p9 = pnand %p1495_p8, %p1489_p5 }
  0x17   :  { %1499 = shalt.err (!%p1496_p9)
}
  0x18   :  { %s1530_s27 = smov 512   ;;  %s1531_s28 = smov 32  }
  0x19   :  { %42 = dma.hbm_to_vmem [thread:$0]  %s2004_s1, 10752, %s37_s25, [#allocation6], %s1530_s27, %s1530_s27, %s1531_s28  }
  0x1a   :  { %1520 = dma.done.wait [#allocation3], 7808  }
  0x1b   :  { %1521 = vsyncadd [#allocation3], 4294959488 }
  0x1c   :  { %1522 = dma.done.wait [#allocation6], 10752  }
  0x1d   :  { %1523 = vsyncadd [#allocation6], 4294956544  ;;  %v1532_v0 = vmov 0.0   ;;  %v1533_v1 = vmov 0   ;;  %v82_v2 = vld [vmem:[#allocation2 + $0x78] sm:$0xff]  ;;  %v81_v3 = vld [vmem:[#allocation2 + $0x70] sm:$0xff] }
  0x1e   :  { %406 = vmatprep.subr.mxu0 %v1532_v0  ;;  %576 = vmatprep.subr.mxu1 %v1532_v0  ;;  %v114_v4 = vld [vmem:[#allocation2 + $0x178] sm:$0xff]  ;;  %v80_v5 = vld [vmem:[#allocation2 + $0x68] sm:$0xff]  ;;  %v113_v6 = vld [vmem:[#allocation2 + $0x170] sm:$0xff]  ;;  %vm402_vm0 = vcmask 1043456   ;;  %vm338_vm1 = vcmask 818176   ;;  %vm844_vm2 = vcmask 277504  }
  0x1f   :  { %1455 = vset.pattern.permute.xlu1 %v1533_v1  ;;  %1454 = vset.pattern.permute.xlu0 %v1533_v1  ;;  %v112_v7 = vld [vmem:[#allocation2 + $0x168] sm:$0xff]  ;;  %v79_v8 = vld [vmem:[#allocation2 + $0x60] sm:$0xff]  ;;  %v78_v10 = vld [vmem:[#allocation2 + $0x58] sm:$0xff]  ;;  %vm866_vm3 = vcmask 1041408   ;;  %vm1534_vm4 = vmmov 0   ;;  %vm1015_vm5 = vcmask 1040384  }
  0x20   :  { %407 = vmatpush1.msra.mxu0 %v82_v2  ;;  %577 = vmatpush1.msra.mxu1 %v114_v4  ;;  %v111_v9 = vld [vmem:[#allocation2 + $0x160] sm:$0xff]  ;;  %v110_v11 = vld [vmem:[#allocation2 + $0x158] sm:$0xff]  ;;  %v77_v12 = vld [vmem:[#allocation2 + $0x50] sm:$0xff]  ;;  %vm1005_vm6 = vcmask 400384   ;;  %vm1126_vm7 = vcmask 195584   ;;  %vm1302_vm8 = vcmask 1045504  }
  0x21   :  { %408 = vmatprep.subr.mxu0 %v1532_v0  ;;  %578 = vmatprep.subr.mxu1 %v1532_v0  ;;  %v109_v13 = vld [vmem:[#allocation2 + $0x150] sm:$0xff]  ;;  %v76_v14 = vld [vmem:[#allocation2 + $0x48] sm:$0xff]  ;;  %v75_v16 = vld [vmem:[#allocation2 + $0x40] sm:$0xff] }
  0x22   :  { %409 = vmatpush1.msra.mxu0 %v81_v3  ;;  %579 = vmatpush1.msra.mxu1 %v113_v6  ;;  %v108_v15 = vld [vmem:[#allocation2 + $0x148] sm:$0xff]  ;;  %v107_v17 = vld [vmem:[#allocation2 + $0x140] sm:$0xff]  ;;  %v74_v18 = vld [vmem:[#allocation2 + $0x38] sm:$0xff] }
  0x23   :  { %410 = vmatprep.subr.mxu0 %v1532_v0  ;;  %580 = vmatprep.subr.mxu1 %v1532_v0  ;;  %v106_v19 = vld [vmem:[#allocation2 + $0x138] sm:$0xff]  ;;  %v73_v20 = vld [vmem:[#allocation2 + $0x30] sm:$0xff]  ;;  %v72_v22 = vld [vmem:[#allocation2 + $0x28] sm:$0xff] }
  0x24   :  { %411 = vmatpush1.msra.mxu0 %v80_v5  ;;  %581 = vmatpush1.msra.mxu1 %v112_v7  ;;  %v105_v21 = vld [vmem:[#allocation2 + $0x130] sm:$0xff]  ;;  %v104_v23 = vld [vmem:[#allocation2 + $0x128] sm:$0xff]  ;;  %v71_v24 = vld [vmem:[#allocation2 + $0x20] sm:$0xff] }
  0x25   :  { %412 = vmatprep.subr.mxu0 %v1532_v0  ;;  %582 = vmatprep.subr.mxu1 %v1532_v0  ;;  %v103_v25 = vld [vmem:[#allocation2 + $0x120] sm:$0xff]  ;;  %v70_v26 = vld [vmem:[#allocation2 + $0x18] sm:$0xff]  ;;  %v69_v28 = vld [vmem:[#allocation2 + $0x10] sm:$0xff] }
  0x26   :  { %413 = vmatpush1.msra.mxu0 %v79_v8  ;;  %583 = vmatpush1.msra.mxu1 %v111_v9  ;;  %v102_v27 = vld [vmem:[#allocation2 + $0x118] sm:$0xff]  ;;  %v101_v29 = vld [vmem:[#allocation2 + $0x110] sm:$0xff]  ;;  %v68_v30 = vld [vmem:[#allocation2 + $0x8] sm:$0xff] }
  0x27   :  { %414 = vmatprep.subr.mxu0 %v1532_v0  ;;  %584 = vmatprep.subr.mxu1 %v1532_v0  ;;  %v100_v31 = vld [vmem:[#allocation2 + $0x108] sm:$0xff]  ;;  %v67_v32 = vld [vmem:[#allocation2] sm:$0xff]  ;;  %v98_v34 = vld [vmem:[#allocation2 + $0xf8] sm:$0xff] }
  0x28   :  { %415 = vmatpush1.msra.mxu0 %v78_v10  ;;  %585 = vmatpush1.msra.mxu1 %v110_v11  ;;  %v99_v33 = vld [vmem:[#allocation2 + $0x100] sm:$0xff]  ;;  %v97_v36 = vld [vmem:[#allocation2 + $0xf0] sm:$0xff]  ;;  %v126_v37 = vld [vmem:[#allocation2 + $0x1d8] sm:$0xff] }
  0x29   :  { %416 = vmatprep.subr.mxu0 %v1532_v0  ;;  %586 = vmatprep.subr.mxu1 %v1532_v0  ;;  %v127_v35 = vld [vmem:[#allocation2 + $0x1e0] sm:$0xf]  ;;  %v96_v38 = vld [vmem:[#allocation2 + $0xe8] sm:$0xff]  ;;  %v125_v39 = vld [vmem:[#allocation2 + $0x1d0] sm:$0xff] }
  0x2a   :  { %417 = vmatpush1.msra.mxu0 %v77_v12  ;;  %587 = vmatpush1.msra.mxu1 %v109_v13  ;;  %v95_v40 = vld [vmem:[#allocation2 + $0xe0] sm:$0xff]  ;;  %v124_v41 = vld [vmem:[#allocation2 + $0x1c8] sm:$0xff]  ;;  %v94_v42 = vld [vmem:[#allocation2 + $0xd8] sm:$0xff] }
  0x2b   :  { %418 = vmatprep.subr.mxu0 %v1532_v0  ;;  %588 = vmatprep.subr.mxu1 %v1532_v0  ;;  %v123_v43 = vld [vmem:[#allocation2 + $0x1c0] sm:$0xff]  ;;  %v93_v44 = vld [vmem:[#allocation2 + $0xd0] sm:$0xff]  ;;  %v122_v45 = vld [vmem:[#allocation2 + $0x1b8] sm:$0xff] }
  0x2c   :  { %419 = vmatpush1.msra.mxu0 %v76_v14  ;;  %589 = vmatpush1.msra.mxu1 %v108_v15  ;;  %v92_v46 = vld [vmem:[#allocation2 + $0xc8] sm:$0xff]  ;;  %v121_v47 = vld [vmem:[#allocation2 + $0x1b0] sm:$0xff]  ;;  %v91_v48 = vld [vmem:[#allocation2 + $0xc0] sm:$0xff] }
  0x2d   :  { %420 = vmatprep.subr.mxu0 %v1532_v0  ;;  %590 = vmatprep.subr.mxu1 %v1532_v0  ;;  %v120_v49 = vld [vmem:[#allocation2 + $0x1a8] sm:$0xff]  ;;  %v90_v50 = vld [vmem:[#allocation2 + $0xb8] sm:$0xff]  ;;  %v119_v51 = vld [vmem:[#allocation2 + $0x1a0] sm:$0xff] }
  0x2e   :  { %421 = vmatpush1.msra.mxu0 %v75_v16  ;;  %591 = vmatpush1.msra.mxu1 %v107_v17  ;;  %v89_v52 = vld [vmem:[#allocation2 + $0xb0] sm:$0xff]  ;;  %v118_v53 = vld [vmem:[#allocation2 + $0x198] sm:$0xff]  ;;  %v88_v54 = vld [vmem:[#allocation2 + $0xa8] sm:$0xff] }
  0x2f   :  { %422 = vmatprep.subr.mxu0 %v1532_v0  ;;  %592 = vmatprep.subr.mxu1 %v1532_v0  ;;  %v117_v55 = vld [vmem:[#allocation2 + $0x190] sm:$0xff]  ;;  %v87_v56 = vld [vmem:[#allocation2 + $0xa0] sm:$0xff]  ;;  %v116_v57 = vld [vmem:[#allocation2 + $0x188] sm:$0xff] }
  0x30   :  { %423 = vmatpush1.msra.mxu0 %v74_v18  ;;  %593 = vmatpush1.msra.mxu1 %v106_v19  ;;  %v86_v58 = vld [vmem:[#allocation2 + $0x98] sm:$0xff]  ;;  %v129_v59 = vld [vmem:[#allocation5 + $0x8] sm:$0xff]  ;;  %v115_v61 = vld [vmem:[#allocation2 + $0x180] sm:$0xff] }
  0x31   :  { %424 = vmatprep.subr.mxu0 %v1532_v0  ;;  %594 = vmatprep.subr.mxu1 %v1532_v0  ;;  %v85_v60 = vld [vmem:[#allocation2 + $0x90] sm:$0xff]  ;;  %v131_v62 = vld [vmem:[#allocation5 + $0x18] sm:$0xff]  ;;  %v84_v63 = vld [vmem:[#allocation2 + $0x88] sm:$0xff] }
  0x32   :  { %425 = vmatpush1.msra.mxu0 %v73_v20  ;;  %595 = vmatpush1.msra.mxu1 %v105_v21  ;;  %v130_v1 = vld [vmem:[#allocation5 + $0x10] sm:$0xff]  ;;  %v135_v2 = vld [vmem:[#allocation5 + $0x38] sm:$0xff]  ;;  %v225_v4 = vld [vmem:[%s2005_s2 + $0x68] sm:$0xff] }
  0x33   :  { %426 = vmatprep.subr.mxu0 %v1532_v0  ;;  %596 = vmatprep.subr.mxu1 %v1532_v0  ;;  %v83_v3 = vld [vmem:[#allocation2 + $0x80] sm:$0xff]  ;;  %v128_v5 = vld [vmem:[#allocation5] sm:$0xff]  ;;  %v227_v6 = vld [vmem:[%s2005_s2 + $0x78] sm:$0xff] }
  0x34   :  { %427 = vmatpush1.msra.mxu0 %v72_v22  ;;  %597 = vmatpush1.msra.mxu1 %v104_v23  ;;  %v133_v7 = vld [vmem:[#allocation5 + $0x28] sm:$0xff]  ;;  %v134_v8 = vld [vmem:[#allocation5 + $0x30] sm:$0xff]  ;;  %v139_v9 = vld [vmem:[#allocation5 + $0x58] sm:$0xff] }
  0x35   :  { %428 = vmatprep.subr.mxu0 %v1532_v0  ;;  %598 = vmatprep.subr.mxu1 %v1532_v0  ;;  %v224_v10 = vld [vmem:[%s2005_s2 + $0x60] sm:$0xff]  ;;  %v132_v11 = vld [vmem:[#allocation5 + $0x20] sm:$0xff]  ;;  %v226_v12 = vld [vmem:[%s2005_s2 + $0x70] sm:$0xff] }
  0x36   :  { %429 = vmatpush1.msra.mxu0 %v71_v24  ;;  %599 = vmatpush1.msra.mxu1 %v103_v25  ;;  %v137_v13 = vld [vmem:[#allocation5 + $0x48] sm:$0xff]  ;;  %v138_v14 = vld [vmem:[#allocation5 + $0x50] sm:$0xff]  ;;  %v143_v15 = vld [vmem:[#allocation5 + $0x78] sm:$0xff] }
  0x37   :  { %430 = vmatprep.subr.mxu0 %v1532_v0  ;;  %600 = vmatprep.subr.mxu1 %v1532_v0  ;;  %v222_v16 = vld [vmem:[%s2005_s2 + $0x50] sm:$0xff]  ;;  %v136_v17 = vld [vmem:[#allocation5 + $0x40] sm:$0xff]  ;;  %v223_v18 = vld [vmem:[%s2005_s2 + $0x58] sm:$0xff] }
  0x38   :  { %431 = vmatpush1.msra.mxu0 %v70_v26  ;;  %601 = vmatpush1.msra.mxu1 %v102_v27  ;;  %v141_v19 = vld [vmem:[#allocation5 + $0x68] sm:$0xff]  ;;  %v142_v20 = vld [vmem:[#allocation5 + $0x70] sm:$0xff]  ;;  %v147_v21 = vld [vmem:[#allocation5 + $0x98] sm:$0xff] }
  0x39   :  { %432 = vmatprep.subr.mxu0 %v1532_v0  ;;  %602 = vmatprep.subr.mxu1 %v1532_v0  ;;  %v220_v22 = vld [vmem:[%s2005_s2 + $0x40] sm:$0xff]  ;;  %v140_v23 = vld [vmem:[#allocation5 + $0x60] sm:$0xff]  ;;  %v145_v25 = vld [vmem:[#allocation5 + $0x88] sm:$0xff] }
  0x3a   :  { %433 = vmatpush1.msra.mxu0 %v69_v28  ;;  %603 = vmatpush1.msra.mxu1 %v101_v29  ;;  %v221_v24 = vld [vmem:[%s2005_s2 + $0x48] sm:$0xff]  ;;  %v146_v26 = vld [vmem:[#allocation5 + $0x90] sm:$0xff]  ;;  %v151_v27 = vld [vmem:[#allocation5 + $0xb8] sm:$0xff] }
  0x3b   :  { %434 = vmatprep.subr.mxu0 %v1532_v0  ;;  %604 = vmatprep.subr.mxu1 %v1532_v0  ;;  %v218_v28 = vld [vmem:[%s2005_s2 + $0x30] sm:$0xff]  ;;  %v144_v29 = vld [vmem:[#allocation5 + $0x80] sm:$0xff] }
  0x3c   :  { %435 = vmatpush1.msra.mxu0 %v68_v30  ;;  %605 = vmatpush1.msra.mxu1 %v100_v31  ;;  %v219_v30 = vld [vmem:[%s2005_s2 + $0x38] sm:$0xff]  ;;  %v149_v31 = vld [vmem:[#allocation5 + $0xa8] sm:$0xff] }
  0x3d   :  { %436 = vmatprep.subr.mxu0 %v1532_v0  ;;  %606 = vmatprep.subr.mxu1 %v1532_v0 }
  0x3e   :  { %437 = vmatpush1.msra.mxu0 %v67_v32  ;;  %607 = vmatpush1.msra.mxu1 %v99_v33  ;;  %v150_v32 = vld [vmem:[#allocation5 + $0xb0] sm:$0xff]  ;;  %v155_v33 = vld [vmem:[#allocation5 + $0xd8] sm:$0xff] }
  0x3f   :  { %438 = vmatprep.subr.mxu0 %v1532_v0  ;;  %614 = vmatprep.subr.mxu1 %v1532_v0 }
  0x40   :  { %439 = vmatpush2.msra.mxu0 %v98_v34  ;;  %1339 = vmatpush2.msk.msra.mxu1 %vm402_vm0, %v127_v35  ;;  %v216_v34 = vld [vmem:[%s2005_s2 + $0x20] sm:$0xff]  ;;  %v148_v35 = vld [vmem:[#allocation5 + $0xa0] sm:$0xff] }
  0x41   :  { %440 = vmatprep.subr.mxu0 %v1532_v0  ;;  %616 = vmatprep.subr.mxu1 %v1532_v0 }
  0x42   :  { %441 = vmatpush2.msra.mxu0 %v97_v36  ;;  %617 = vmatpush2.msra.mxu1 %v126_v37  ;;  %v217_v36 = vld [vmem:[%s2005_s2 + $0x28] sm:$0xff]  ;;  %v153_v37 = vld [vmem:[#allocation5 + $0xc8] sm:$0xff] }
  0x43   :  { %442 = vmatprep.subr.mxu0 %v1532_v0  ;;  %618 = vmatprep.subr.mxu1 %v1532_v0 }
  0x44   :  { %443 = vmatpush2.msra.mxu0 %v96_v38  ;;  %619 = vmatpush2.msra.mxu1 %v125_v39  ;;  %v154_v38 = vld [vmem:[#allocation5 + $0xd0] sm:$0xff]  ;;  %v159_v39 = vld [vmem:[#allocation5 + $0xf8] sm:$0xff] }
  0x45   :  { %444 = vmatprep.subr.mxu0 %v1532_v0  ;;  %620 = vmatprep.subr.mxu1 %v1532_v0 }
  0x46   :  { %445 = vmatpush2.msra.mxu0 %v95_v40  ;;  %621 = vmatpush2.msra.mxu1 %v124_v41  ;;  %v214_v40 = vld [vmem:[%s2005_s2 + $0x10] sm:$0xff]  ;;  %v152_v41 = vld [vmem:[#allocation5 + $0xc0] sm:$0xff] }
  0x47   :  { %446 = vmatprep.subr.mxu0 %v1532_v0  ;;  %622 = vmatprep.subr.mxu1 %v1532_v0 }
  0x48   :  { %447 = vmatpush2.msra.mxu0 %v94_v42  ;;  %623 = vmatpush2.msra.mxu1 %v123_v43  ;;  %v215_v42 = vld [vmem:[%s2005_s2 + $0x18] sm:$0xff]  ;;  %v157_v43 = vld [vmem:[#allocation5 + $0xe8] sm:$0xff] }
  0x49   :  { %448 = vmatprep.subr.mxu0 %v1532_v0  ;;  %624 = vmatprep.subr.mxu1 %v1532_v0 }
  0x4a   :  { %449 = vmatpush2.msra.mxu0 %v93_v44  ;;  %625 = vmatpush2.msra.mxu1 %v122_v45  ;;  %v158_v44 = vld [vmem:[#allocation5 + $0xf0] sm:$0xff]  ;;  %v163_v45 = vld [vmem:[#allocation5 + $0x118] sm:$0xff] }
  0x4b   :  { %450 = vmatprep.subr.mxu0 %v1532_v0  ;;  %626 = vmatprep.subr.mxu1 %v1532_v0 }
  0x4c   :  { %451 = vmatpush2.msra.mxu0 %v92_v46  ;;  %627 = vmatpush2.msra.mxu1 %v121_v47  ;;  %v212_v46 = vld [vmem:[%s2005_s2] sm:$0xff]  ;;  %v156_v47 = vld [vmem:[#allocation5 + $0xe0] sm:$0xff] }
  0x4d   :  { %452 = vmatprep.subr.mxu0 %v1532_v0  ;;  %628 = vmatprep.subr.mxu1 %v1532_v0 }
  0x4e   :  { %453 = vmatpush2.msra.mxu0 %v91_v48  ;;  %629 = vmatpush2.msra.mxu1 %v120_v49  ;;  %v213_v48 = vld [vmem:[%s2005_s2 + $0x8] sm:$0xff]  ;;  %v161_v49 = vld [vmem:[#allocation5 + $0x108] sm:$0xff] }
  0x4f   :  { %454 = vmatprep.subr.mxu0 %v1532_v0  ;;  %630 = vmatprep.subr.mxu1 %v1532_v0 }
  0x50   :  { %455 = vmatpush2.msra.mxu0 %v90_v50  ;;  %631 = vmatpush2.msra.mxu1 %v119_v51  ;;  %v162_v50 = vld [vmem:[#allocation5 + $0x110] sm:$0xff]  ;;  %v167_v51 = vld [vmem:[#allocation5 + $0x138] sm:$0xff] }
  0x51   :  { %456 = vmatprep.subr.mxu0 %v1532_v0  ;;  %632 = vmatprep.subr.mxu1 %v1532_v0 }
  0x52   :  { %457 = vmatpush2.msra.mxu0 %v89_v52  ;;  %633 = vmatpush2.msra.mxu1 %v118_v53  ;;  %v231_v52 = vld [vmem:[%s2005_s2 + $0x98] sm:$0xff]  ;;  %v160_v53 = vld [vmem:[#allocation5 + $0x100] sm:$0xff] }
  0x53   :  { %458 = vmatprep.subr.mxu0 %v1532_v0  ;;  %634 = vmatprep.subr.mxu1 %v1532_v0 }
  0x54   :  { %459 = vmatpush2.msra.mxu0 %v88_v54  ;;  %635 = vmatpush2.msra.mxu1 %v117_v55  ;;  %v232_v54 = vld [vmem:[%s2005_s2 + $0xa0] sm:$0x3]  ;;  %v165_v55 = vld [vmem:[#allocation5 + $0x128] sm:$0xff] }
  0x55   :  { %460 = vmatprep.subr.mxu0 %v1532_v0  ;;  %636 = vmatprep.subr.mxu1 %v1532_v0 }
  0x56   :  { %461 = vmatpush2.msra.mxu0 %v87_v56  ;;  %637 = vmatpush2.msra.mxu1 %v116_v57  ;;  %v166_v56 = vld [vmem:[#allocation5 + $0x130] sm:$0xff]  ;;  %v171_v57 = vld [vmem:[#allocation5 + $0x158] sm:$0xff] }
  0x57   :  { %462 = vmatprep.subr.mxu0 %v1532_v0  ;;  %638 = vmatprep.subr.mxu1 %v1532_v0 }
  0x58   :  { %463 = vmatpush2.msra.mxu0 %v86_v58  ;;  %470 = vmatprep.mubr.f32.mxu0 %v129_v59  ;;  %v229_v58 = vld [vmem:[%s2005_s2 + $0x88] sm:$0xff] }
  0x59   :  { %464 = vmatprep.subr.mxu0 %v1532_v0  ;;  %639 = vmatpush2.msra.mxu1 %v115_v61  ;;  %v164_v59 = vld [vmem:[#allocation5 + $0x120] sm:$0xff]  ;;  %v169_v61 = vld [vmem:[#allocation5 + $0x148] sm:$0xff] }
  0x5a   :  { %465 = vmatpush2.msra.mxu0 %v85_v60  ;;  %1340 = vmatprep.mubr.msk.f32.mxu1 %vm338_vm1, %v131_v62  ;;  %v230_v60 = vld [vmem:[%s2005_s2 + $0x90] sm:$0xff]  ;;  %v170_v62 = vld [vmem:[#allocation5 + $0x150] sm:$0xff] }
  0x5b   :  { %466 = vmatprep.subr.mxu0 %v1532_v0  ;;  %641 = vmatmul.mubr.f32.vlgmr.msra.gmra.mxu1 %v130_v1  ;;  %v808_v1 = vld [vmem:[%s2007_s4 + $0x30] sm:$0x1] }
  0x5c   :  { %467 = vmatpush2.msra.mxu0 %v84_v63  ;;  %1341 = vmatprep.mubr.msk.f32.mxu1 %vm338_vm1, %v135_v2  ;;  %v175_v63 = vld [vmem:[#allocation5 + $0x178] sm:$0xff]  ;;  %v168_v2 = vld [vmem:[#allocation5 + $0x140] sm:$0xff] }
  0x5d   :  { %468 = vmatprep.subr.mxu0 %v1532_v0  ;;  %300 = vperm.xlu1 %1455, %v225_v4   ;;  %v173_v4 = vld [vmem:[#allocation5 + $0x168] sm:$0xff] }
  0x5e   :  { %469 = vmatpush2.msra.mxu0 %v83_v3  ;;  %310 = vperm.xlu0 %1454, %v227_v6   ;;  %v228_v3 = vld [vmem:[%s2005_s2 + $0x80] sm:$0xff] }
  0x5f   :  { %471 = vmatmul.mubr.f32.vlgmr.msra.gmra.mxu0 %v128_v5  ;;  %646 = vmatmul.mubr.f32.gmra.mxu1 %v134_v8  ;;  %v174_v5 = vld [vmem:[#allocation5 + $0x170] sm:$0xff]  ;;  %v179_v6 = vld [vmem:[#allocation5 + $0x198] sm:$0xff]  ;;  %v172_v8 = vld [vmem:[#allocation5 + $0x160] sm:$0xff] }
  0x60   :  { %475 = vmatprep.mubr.f32.mxu0 %v133_v7  ;;  %1342 = vmatprep.mubr.msk.f32.mxu1 %vm338_vm1, %v139_v9  ;;  %v806_v7 = vld [vmem:[%s2007_s4 + $0x20] sm:$0xff]  ;;  %v807_v9 = vld [vmem:[%s2007_s4 + $0x28] sm:$0xff] }
  0x61   :  { %870 = vmatprep.subr.mxu1 %v1532_v0  ;;  %295 = vperm.xlu1 %1455, %v224_v10   ;;  %v177_v10 = vld [vmem:[#allocation5 + $0x188] sm:$0xff] }
  0x62   :  { %1397 = vmatprep.subr.mxu0 %v1532_v0  ;;  %305 = vperm.xlu0 %1454, %v226_v12   ;;  %v183_v12 = vld [vmem:[#allocation5 + $0x1b8] sm:$0xff] }
  0x63   :  { %476 = vmatmul.mubr.f32.gmra.mxu0 %v132_v11  ;;  %651 = vmatmul.mubr.f32.gmra.mxu1 %v138_v14  ;;  %v178_v11 = vld [vmem:[#allocation5 + $0x190] sm:$0xff]  ;;  %v176_v14 = vld [vmem:[#allocation5 + $0x180] sm:$0xff] }
  0x64   :  { %480 = vmatprep.mubr.f32.mxu0 %v137_v13  ;;  %1343 = vmatprep.mubr.msk.f32.mxu1 %vm338_vm1, %v143_v15  ;;  %v804_v13 = vld [vmem:[%s2007_s4 + $0x10] sm:$0xff]  ;;  %v805_v15 = vld [vmem:[%s2007_s4 + $0x18] sm:$0xff] }
  0x65   :  { %285 = vperm.xlu1 %1455, %v222_v16   ;;  %v181_v16 = vld [vmem:[#allocation5 + $0x1a8] sm:$0xff] }
  0x66   :  { %290 = vperm.xlu0 %1454, %v223_v18   ;;  %v187_v18 = vld [vmem:[#allocation5 + $0x1d8] sm:$0xff] }
  0x67   :  { %481 = vmatmul.mubr.f32.gmra.mxu0 %v136_v17  ;;  %656 = vmatmul.mubr.f32.gmra.mxu1 %v142_v20  ;;  %v182_v17 = vld [vmem:[#allocation5 + $0x1b0] sm:$0xff]  ;;  %v180_v20 = vld [vmem:[#allocation5 + $0x1a0] sm:$0xff] }
  0x68   :  { %485 = vmatprep.mubr.f32.mxu0 %v141_v19  ;;  %1344 = vmatprep.mubr.msk.f32.mxu1 %vm338_vm1, %v147_v21  ;;  %v802_v19 = vld [vmem:[%s2007_s4] sm:$0xff]  ;;  %v803_v21 = vld [vmem:[%s2007_s4 + $0x8] sm:$0xff] }
  0x69   :  { %275 = vperm.xlu1 %1455, %v220_v22   ;;  %v185_v22 = vld [vmem:[#allocation5 + $0x1c8] sm:$0xff] }
  0x6a   :  { %280 = vperm.xlu0 %1454, %v221_v24   ;;  %v191_v24 = vld [vmem:[#allocation5 + $0x1f8] sm:$0xff] }
  0x6b   :  { %486 = vmatmul.mubr.f32.gmra.mxu0 %v140_v23  ;;  %661 = vmatmul.mubr.f32.gmra.mxu1 %v146_v26  ;;  %v186_v23 = vld [vmem:[#allocation5 + $0x1d0] sm:$0xff]  ;;  %v184_v26 = vld [vmem:[#allocation5 + $0x1c0] sm:$0xff] }
  0x6c   :  { %490 = vmatprep.mubr.f32.mxu0 %v145_v25  ;;  %1345 = vmatprep.mubr.msk.f32.mxu1 %vm338_vm1, %v151_v27  ;;  %v988_v25 = vld [vmem:[%s2009_s6 + $0x8] sm:$0xff]  ;;  %v989_v27 = vld [vmem:[%s2009_s6 + $0x10] sm:$0xff] }
  0x6d   :  { %265 = vperm.xlu1 %1455, %v218_v28   ;;  %v189_v28 = vld [vmem:[#allocation5 + $0x1e8] sm:$0xff] }
  0x6e   :  { %270 = vperm.xlu0 %1454, %v219_v30   ;;  %v195_v30 = vld [vmem:[#allocation5 + $0x218] sm:$0xff] }
  0x6f   :  { %491 = vmatmul.mubr.f32.gmra.mxu0 %v144_v29  ;;  %666 = vmatmul.mubr.f32.gmra.mxu1 %v150_v32  ;;  %v190_v29 = vld [vmem:[#allocation5 + $0x1f0] sm:$0xff]  ;;  %v188_v32 = vld [vmem:[#allocation5 + $0x1e0] sm:$0xff] }
  0x70   :  { %495 = vmatprep.mubr.f32.mxu0 %v149_v31  ;;  %1346 = vmatprep.mubr.msk.f32.mxu1 %vm338_vm1, %v155_v33  ;;  %v1110_v31 = vld [vmem:[%s2011_s8 + $0x10] sm:$0xff]  ;;  %v987_v33 = vld [vmem:[%s2009_s6] sm:$0xff] }
  0x71   :  { %255 = vperm.xlu1 %1455, %v216_v34   ;;  %v193_v34 = vld [vmem:[#allocation5 + $0x208] sm:$0xff] }
  0x72   :  { %260 = vperm.xlu0 %1454, %v217_v36   ;;  %v199_v36 = vld [vmem:[#allocation5 + $0x238] sm:$0xff] }
  0x73   :  { %496 = vmatmul.mubr.f32.gmra.mxu0 %v148_v35  ;;  %671 = vmatmul.mubr.f32.gmra.mxu1 %v154_v38  ;;  %v194_v35 = vld [vmem:[#allocation5 + $0x210] sm:$0xff]  ;;  %v192_v38 = vld [vmem:[#allocation5 + $0x200] sm:$0xff] }
  0x74   :  { %500 = vmatprep.mubr.f32.mxu0 %v153_v37  ;;  %1347 = vmatprep.mubr.msk.f32.mxu1 %vm338_vm1, %v159_v39  ;;  %v1108_v37 = vld [vmem:[%s2011_s8] sm:$0xff]  ;;  %v1109_v39 = vld [vmem:[%s2011_s8 + $0x8] sm:$0xff] }
  0x75   :  { %245 = vperm.xlu1 %1455, %v214_v40   ;;  %v197_v40 = vld [vmem:[#allocation5 + $0x228] sm:$0xff] }
  0x76   :  { %250 = vperm.xlu0 %1454, %v215_v42   ;;  %v203_v42 = vld [vmem:[#allocation5 + $0x258] sm:$0xff] }
  0x77   :  { %501 = vmatmul.mubr.f32.gmra.mxu0 %v152_v41  ;;  %676 = vmatmul.mubr.f32.gmra.mxu1 %v158_v44  ;;  %v198_v41 = vld [vmem:[#allocation5 + $0x230] sm:$0xff]  ;;  %v1223_v44 = vld [vmem:[%s2013_s10] sm:$0x3f] }
  0x78   :  { %505 = vmatprep.mubr.f32.mxu0 %v157_v43  ;;  %1348 = vmatprep.mubr.msk.f32.mxu1 %vm338_vm1, %v163_v45  ;;  %v196_v43 = vld [vmem:[#allocation5 + $0x220] sm:$0xff]  ;;  %v201_v45 = vld [vmem:[#allocation5 + $0x248] sm:$0xff] }
  0x79   :  { %235 = vperm.xlu1 %1455, %v212_v46   ;;  %v202_v46 = vld [vmem:[#allocation5 + $0x250] sm:$0xff] }
  0x7a   :  { %240 = vperm.xlu0 %1454, %v213_v48   ;;  %v200_v48 = vld [vmem:[#allocation5 + $0x240] sm:$0xff] }
  0x7b   :  { %506 = vmatmul.mubr.f32.gmra.mxu0 %v156_v47  ;;  %681 = vmatmul.mubr.f32.gmra.mxu1 %v162_v50  ;;  %v207_v47 = vld [vmem:[#allocation5 + $0x278] sm:$0xff]  ;;  %v206_v50 = vld [vmem:[#allocation5 + $0x270] sm:$0xff] }
  0x7c   :  { %510 = vmatprep.mubr.f32.mxu0 %v161_v49  ;;  %1349 = vmatprep.mubr.msk.f32.mxu1 %vm338_vm1, %v167_v51  ;;  %v205_v49 = vld [vmem:[#allocation5 + $0x268] sm:$0xff]  ;;  %v211_v51 = vld [vmem:[#allocation5 + $0x298] sm:$0x3] }
  0x7d   :  { %330 = vperm.xlu1 %1455, %v231_v52   ;;  %v204_v52 = vld [vmem:[#allocation5 + $0x260] sm:$0xff] }
  0x7e   :  { %335 = vperm.xlu0 %1454, %v232_v54   ;;  %v210_v54 = vld [vmem:[#allocation5 + $0x290] sm:$0x3] }
  0x7f   :  { %511 = vmatmul.mubr.f32.gmra.mxu0 %v160_v53  ;;  %686 = vmatmul.mubr.f32.gmra.mxu1 %v166_v56  ;;  %v209_v53 = vld [vmem:[#allocation5 + $0x288] sm:$0x3] }
  0x80   :  { %515 = vmatprep.mubr.f32.mxu0 %v165_v55  ;;  %1350 = vmatprep.mubr.msk.f32.mxu1 %vm338_vm1, %v171_v57  ;;  %v208_v55 = vld [vmem:[#allocation5 + $0x280] sm:$0x3] }
  0x81   :  { %320 = vperm.xlu1 %1455, %v229_v58  }
  0x82   :  { %325 = vperm.xlu0 %1454, %v230_v60  }
  0x83   :  { %516 = vmatmul.mubr.f32.gmra.mxu0 %v164_v59  ;;  %691 = vmatmul.mubr.f32.gmra.mxu1 %v170_v62 }
  0x84   :  { %520 = vmatprep.mubr.f32.mxu0 %v169_v61  ;;  %1351 = vmatprep.mubr.msk.f32.mxu1 %vm338_vm1, %v175_v63 }
  0x85   :  { %841 = vperm.xlu1 %1455, %v808_v1  }
  0x86   :  { %315 = vperm.xlu0 %1454, %v228_v3  }
  0x87   :  { %521 = vmatmul.mubr.f32.gmra.mxu0 %v168_v2  ;;  %696 = vmatmul.mubr.f32.gmra.mxu1 %v174_v5  ;;  %v789_v2 = vld [vmem:[%s2006_s3 + $0x8] sm:$0xff] }
  0x88   :  { %525 = vmatprep.mubr.f32.mxu0 %v173_v4  ;;  %1352 = vmatprep.mubr.msk.f32.mxu1 %vm338_vm1, %v179_v6 }
  0x89   :  { %831 = vperm.xlu1 %1455, %v806_v7  }
  0x8a   :  { %836 = vperm.xlu0 %1454, %v807_v9  }
  0x8b   :  { %526 = vmatmul.mubr.f32.gmra.mxu0 %v172_v8  ;;  %701 = vmatmul.mubr.f32.gmra.mxu1 %v178_v11 }
  0x8c   :  { %530 = vmatprep.mubr.f32.mxu0 %v177_v10  ;;  %1353 = vmatprep.mubr.msk.f32.mxu1 %vm338_vm1, %v183_v12 }
  0x8d   :  { %821 = vperm.xlu1 %1455, %v804_v13  }
  0x8e   :  { %826 = vperm.xlu0 %1454, %v805_v15  }
  0x8f   :  { %531 = vmatmul.mubr.f32.gmra.mxu0 %v176_v14  ;;  %706 = vmatmul.mubr.f32.gmra.mxu1 %v182_v17 }
  0x90   :  { %535 = vmatprep.mubr.f32.mxu0 %v181_v16  ;;  %1354 = vmatprep.mubr.msk.f32.mxu1 %vm338_vm1, %v187_v18 }
  0x91   :  { %811 = vperm.xlu1 %1455, %v802_v19  }
  0x92   :  { %816 = vperm.xlu0 %1454, %v803_v21  }
  0x93   :  { %536 = vmatmul.mubr.f32.gmra.mxu0 %v180_v20  ;;  %711 = vmatmul.mubr.f32.gmra.mxu1 %v186_v23 }
  0x94   :  { %540 = vmatprep.mubr.f32.mxu0 %v185_v22  ;;  %1355 = vmatprep.mubr.msk.f32.mxu1 %vm338_vm1, %v191_v24 }
  0x95   :  { %997 = vperm.xlu1 %1455, %v988_v25  }
  0x96   :  { %1002 = vperm.xlu0 %1454, %v989_v27  }
  0x97   :  { %541 = vmatmul.mubr.f32.gmra.mxu0 %v184_v26  ;;  %716 = vmatmul.mubr.f32.gmra.mxu1 %v190_v29 }
  0x98   :  { %545 = vmatprep.mubr.f32.mxu0 %v189_v28  ;;  %1356 = vmatprep.mubr.msk.f32.mxu1 %vm338_vm1, %v195_v30 }
  0x99   :  { %1123 = vperm.xlu1 %1455, %v1110_v31  }
  0x9a   :  { %992 = vperm.xlu0 %1454, %v987_v33  }
  0x9b   :  { %546 = vmatmul.mubr.f32.gmra.mxu0 %v188_v32  ;;  %721 = vmatmul.mubr.f32.gmra.mxu1 %v194_v35 }
  0x9c   :  { %550 = vmatprep.mubr.f32.mxu0 %v193_v34  ;;  %1357 = vmatprep.mubr.msk.f32.mxu1 %vm338_vm1, %v199_v36 }
  0x9d   :  { %1113 = vperm.xlu1 %1455, %v1108_v37  }
  0x9e   :  { %1118 = vperm.xlu0 %1454, %v1109_v39  }
  0x9f   :  { %551 = vmatmul.mubr.f32.gmra.mxu0 %v192_v38  ;;  %726 = vmatmul.mubr.f32.gmra.mxu1 %v198_v41 }
  0xa0   :  { %555 = vmatprep.mubr.f32.mxu0 %v197_v40  ;;  %1358 = vmatprep.mubr.msk.f32.mxu1 %vm338_vm1, %v203_v42 }
  0xa2   :  { %1226 = vperm.xlu0 %1454, %v1223_v44  }
  0xa3   :  { %556 = vmatmul.mubr.f32.gmra.mxu0 %v196_v43  ;;  %731 = vmatmul.mubr.f32.gmra.mxu1 %v202_v46 }
  0xa4   :  { %560 = vmatprep.mubr.f32.mxu0 %v201_v45  ;;  %1359 = vmatprep.mubr.msk.f32.mxu1 %vm338_vm1, %v207_v47 }
  0xa7   :  { %561 = vmatmul.mubr.f32.gmra.mxu0 %v200_v48  ;;  %736 = vmatmul.mubr.f32.gmra.mxu1 %v206_v50 }
  0xa8   :  { %565 = vmatprep.mubr.f32.mxu0 %v205_v49  ;;  %1360 = vmatprep.mubr.msk.f32.mxu1 %vm338_vm1, %v211_v51 }
  0xab   :  { %566 = vmatmul.mubr.f32.gmra.mxu0 %v204_v52  ;;  %741 = vmatmul.mubr.f32.gmra.mxu1 %v210_v54 }
  0xac   :  { %570 = vmatprep.mubr.f32.mxu0 %v209_v53  ;;  %1362 = vmatprep.mubr.msk.f32.mxu1 %vm844_vm2, %v789_v2 }
  0xaf   :  { %571 = vmatmul.mubr.f32.gmra.mxu0 %v208_v55 }
  0xb0   :  { %1411 = vmatprep.mubr.msk.f32.mxu0 %vm1534_vm4, %v1532_v0 }
  0xd8   :  { %v1791_v56 = vpop.permute.xlu1 %300 }
  0xd9   :  { %v1793_v57 = vpop.permute.xlu0 %310 }
  0xdc   :  { %v1795_v58 = vpop.permute.xlu1 %295 }
  0xdd   :  { %v1797_v59 = vpop.permute.xlu0 %305 }
  0xe0   :  { %v1799_v60 = vpop.permute.xlu1 %285 }
  0xe1   :  { %v1801_v61 = vpop.permute.xlu0 %290 }
  0xe4   :  { %v1803_v62 = vpop.permute.xlu1 %275 }
  0xe5   :  { %v1805_v63 = vpop.permute.xlu0 %280 }
  0xe8   :  { %v1807_v1 = vpop.permute.xlu1 %265 }
  0xe9   :  { %v1813_v3 = vpop.permute.xlu0 %270 }
  0xec   :  { %v256_v4 = vpop.permute.xlu1 %255 }
  0xed   :  { %v1815_v5 = vpop.permute.xlu0 %260 }
  0xf0   :  { %v246_v6 = vpop.permute.xlu1 %245 }
  0xf1   :  { %v251_v7 = vpop.permute.xlu0 %250 }
  0xf4   :  { %v236_v9 = vpop.permute.xlu1 %235 }
  0xf5   :  { %v241_v15 = vpop.permute.xlu0 %240 }
 0x11b   :  { %v642_v8 = vpop.f32.mrf.mxu1 }
 0x11d   :  { %v644_v10 = vpop.f32.mrf.mxu1 }
 0x11f   :  { %v472_v11 = vpop.f32.mrf.mxu0  ;;  %v647_v13 = vpop.f32.mrf.mxu1 }
 0x120   :  { %v473_v12 = vadd.f32 %v472_v11, %v236_v9 }
 0x121   :  { %v474_v14 = vpop.f32.mrf.mxu0  ;;  %v649_v17 = vpop.f32.mrf.mxu1 }
 0x122   :  { %v1817_v16 = vadd.f32 %v642_v8, %v473_v12 }
 0x123   :  { %v477_v18 = vpop.f32.mrf.mxu0  ;;  %v652_v20 = vpop.f32.mrf.mxu1 }
 0x124   :  { %v478_v19 = vadd.f32 %v477_v18, %v241_v15 }
 0x125   :  { %v479_v21 = vpop.f32.mrf.mxu0  ;;  %v654_v23 = vpop.f32.mrf.mxu1 }
 0x126   :  { %v1819_v22 = vadd.f32 %v647_v13, %v478_v19 }
 0x127   :  { %v482_v24 = vpop.f32.mrf.mxu0  ;;  %v657_v26 = vpop.f32.mrf.mxu1 }
 0x128   :  { %v483_v25 = vadd.f32 %v482_v24, %v246_v6 }
 0x129   :  { %v484_v27 = vpop.f32.mrf.mxu0  ;;  %v659_v29 = vpop.f32.mrf.mxu1 }
 0x12a   :  { %v1821_v28 = vadd.f32 %v652_v20, %v483_v25 }
 0x12b   :  { %v487_v30 = vpop.f32.mrf.mxu0  ;;  %v662_v32 = vpop.f32.mrf.mxu1 }
 0x12c   :  { %v488_v31 = vadd.f32 %v487_v30, %v251_v7 }
 0x12d   :  { %v489_v33 = vpop.f32.mrf.mxu0  ;;  %v664_v35 = vpop.f32.mrf.mxu1 }
 0x12e   :  { %v1823_v34 = vadd.f32 %v657_v26, %v488_v31 }
 0x12f   :  { %v492_v36 = vpop.f32.mrf.mxu0  ;;  %v1825_v38 = vpop.f32.mrf.mxu1 }
 0x130   :  { %v493_v37 = vadd.f32 %v492_v36, %v256_v4 }
 0x131   :  { %v494_v39 = vpop.f32.mrf.mxu0  ;;  %v669_v41 = vpop.f32.mrf.mxu1 }
 0x132   :  { %v1827_v40 = vadd.f32 %v662_v32, %v493_v37 }
 0x133   :  { %v1829_v42 = vpop.f32.mrf.mxu0  ;;  %v1831_v43 = vpop.f32.mrf.mxu1 }
 0x135   :  { %v499_v44 = vpop.f32.mrf.mxu0  ;;  %v674_v45 = vpop.f32.mrf.mxu1 }
 0x137   :  { %v1833_v46 = vpop.f32.mrf.mxu0  ;;  %v1835_v47 = vpop.f32.mrf.mxu1 }
 0x139   :  { %v504_v48 = vpop.f32.mrf.mxu0  ;;  %v679_v49 = vpop.f32.mrf.mxu1 }
 0x13b   :  { %v1837_v50 = vpop.f32.mrf.mxu0  ;;  %v1839_v51 = vpop.f32.mrf.mxu1 }
 0x13d   :  { %v509_v52 = vpop.f32.mrf.mxu0  ;;  %v684_v53 = vpop.f32.mrf.mxu1 }
 0x13f   :  { %v512_v54 = vpop.f32.mrf.mxu0  ;;  %v687_v55 = vpop.f32.mrf.mxu1 }
 0x141   :  { %v514_v2 = vpop.f32.mrf.mxu0  ;;  %v689_v4 = vpop.f32.mrf.mxu1 }
 0x143   :  { %v517_v6 = vpop.f32.mrf.mxu0  ;;  %v692_v7 = vpop.f32.mrf.mxu1 }
 0x145   :  { %v519_v8 = vpop.f32.mrf.mxu0  ;;  %v694_v9 = vpop.f32.mrf.mxu1 }
 0x147   :  { %v522_v10 = vpop.f32.mrf.mxu0  ;;  %v697_v11 = vpop.f32.mrf.mxu1 }
 0x148   :  { %v523_v2 = vadd.f32 %v522_v10, %v1799_v60 }
 0x149   :  { %v524_v12 = vpop.f32.mrf.mxu0  ;;  %v699_v13 = vpop.f32.mrf.mxu1 }
 0x14b   :  { %v527_v14 = vpop.f32.mrf.mxu0  ;;  %v702_v15 = vpop.f32.mrf.mxu1 }
 0x14c   :  { %v528_v48 = vadd.f32 %v527_v14, %v1801_v61  ;;  %v513_v14 = vadd.f32 %v512_v54, %v1803_v62  ;;  %v503_v62 = vadd.f32 %v1833_v46, %v1807_v1 }
 0x14d   :  { %v529_v17 = vpop.f32.mrf.mxu0  ;;  %v704_v18 = vpop.f32.mrf.mxu1 }
 0x14e   :  { %v698_v12 = vadd.f32 %v697_v11, %v528_v48  ;;  %v683_v54 = vadd.f32 %v1839_v51, %v513_v14  ;;  %v673_v1 = vadd.f32 %v1831_v43, %v503_v62  ;;  %v336_v43 = vpop.permute.xlu0 %335 }
 0x14f   :  { %v532_v19 = vpop.f32.mrf.mxu0  ;;  %v707_v20 = vpop.f32.mrf.mxu1 }
 0x150   :  { %v533_v37 = vadd.f32 %v532_v19, %v1795_v58  ;;  %v693_v19 = vadd.f32 %v692_v7, %v523_v2  ;;  %v757_v11 = vmul.f32 0.2, %v698_v12  ;;  %v754_v46 = vmul.f32 0.2, %v683_v54 }
 0x151   :  { %v534_v21 = vpop.f32.mrf.mxu0  ;;  %v709_v23 = vpop.f32.mrf.mxu1 }
 0x152   :  { %v756_v7 = vmul.f32 0.2, %v693_v19 }
 0x153   :  { %v537_v24 = vpop.f32.mrf.mxu0  ;;  %v712_v25 = vpop.f32.mrf.mxu1 }
 0x154   :  { %v538_v33 = vadd.f32 %v537_v24, %v1791_v56  ;;  %v703_v56 = vadd.f32 %v702_v15, %v533_v37  ;;  %v777_v51 = vmax.f32 %v693_v19, %v756_v7  ;;  %v752_v37 = vmul.f32 0.2, %v673_v1  ;;  %v791_v7 = vld [vmem:[%s2006_s3 + $0x18] sm:$0xff] }
 0x155   :  { %v539_v26 = vpop.f32.mrf.mxu0  ;;  %v714_v27 = vpop.f32.mrf.mxu1  ;;  %v746_v19 = vmul.f32 0.2, %v1817_v16 }
 0x156   :  { %v708_v49 = vadd.f32 %v707_v20, %v538_v33  ;;  %v758_v20 = vmul.f32 0.2, %v703_v56 }
 0x157   :  { %v542_v29 = vpop.f32.mrf.mxu0  ;;  %v717_v31 = vpop.f32.mrf.mxu1 }
 0x158   :  { %v543_v30 = vadd.f32 %v542_v29, %v1797_v59  ;;  %v759_v13 = vmul.f32 0.2, %v708_v49  ;;  %v778_v29 = vmax.f32 %v698_v12, %v757_v11  ;;  %v747_v12 = vmul.f32 0.2, %v1819_v22 }
 0x159   :  { %v544_v32 = vpop.f32.mrf.mxu0  ;;  %v719_v35 = vpop.f32.mrf.mxu1 }
 0x15a   :  { %v713_v39 = vadd.f32 %v712_v25, %v543_v30  ;;  %v780_v15 = vmax.f32 %v708_v49, %v759_v13  ;;  %v779_v25 = vmax.f32 %v703_v56, %v758_v20  ;;  %v773_v49 = vmax.f32 %v673_v1, %v752_v37  ;;  %v801_v1 = vld [vmem:[%s2006_s3 + $0x68] sm:$0x1] }
 0x15b   :  { %v547_v36 = vpop.f32.mrf.mxu0  ;;  %v1845_v44 = vpop.f32.mrf.mxu1 }
 0x15c   :  { %v548_v41 = vadd.f32 %v547_v36, %v1793_v57  ;;  %v760_v4 = vmul.f32 0.2, %v713_v39  ;;  %v518_v57 = vadd.f32 %v517_v6, %v1805_v63  ;;  %v508_v63 = vadd.f32 %v1837_v50, %v1813_v3 }
 0x15d   :  { %v549_v45 = vpop.f32.mrf.mxu0  ;;  %v724_v53 = vpop.f32.mrf.mxu1  ;;  %v498_v3 = vadd.f32 %v1829_v42, %v1815_v5 }
 0x15e   :  { %v718_v52 = vadd.f32 %v717_v31, %v548_v41  ;;  %v781_v21 = vmax.f32 %v713_v39, %v760_v4  ;;  %v688_v6 = vadd.f32 %v687_v55, %v518_v57  ;;  %v678_v50 = vadd.f32 %v1835_v47, %v508_v63  ;;  %v326_v4 = vpop.permute.xlu0 %325 }
 0x15f   :  { %v1848_v59 = vpop.f32.mrf.mxu0  ;;  %v1851_v9 = vpop.f32.mrf.mxu1  ;;  %v668_v5 = vadd.f32 %v1825_v38, %v498_v3  ;;  %v775_v39 = vmax.f32 %v683_v54, %v754_v46  ;;  %v750_v38 = vmul.f32 0.2, %v1827_v40  ;;  %v749_v53 = vmul.f32 0.2, %v1823_v34  ;;  %v788_v54 = vld [vmem:[%s2006_s3] sm:$0xff]  ;;  %v795_v3 = vld [vmem:[%s2006_s3 + $0x38] sm:$0xff] }
 0x160   :  { %v761_v8 = vmul.f32 0.2, %v718_v52  ;;  %v755_v55 = vmul.f32 0.2, %v688_v6  ;;  %v753_v42 = vmul.f32 0.2, %v678_v50  ;;  %v768_v63 = vmax.f32 %v1819_v22, %v747_v12 }
 0x161   :  { %v554_v58 = vpop.f32.mrf.mxu0  ;;  %v729_v18 = vpop.f32.mrf.mxu1  ;;  %v751_v45 = vmul.f32 0.2, %v668_v5  ;;  %v770_v13 = vmax.f32 %v1823_v34, %v749_v53  ;;  %v800_v46 = vld [vmem:[%s2006_s3 + $0x60] sm:$0x1] }
 0x162   :  { %v782_v17 = vmax.f32 %v718_v52, %v761_v8  ;;  %v776_v47 = vmax.f32 %v688_v6, %v755_v55  ;;  %v774_v48 = vmax.f32 %v678_v50, %v753_v42  ;;  %v331_v52 = vpop.permute.xlu1 %330  ;;  %v748_v8 = vmul.f32 0.2, %v1821_v28  ;;  %v794_v50 = vld [vmem:[%s2006_s3 + $0x30] sm:$0xff]  ;;  %v797_v55 = vld [vmem:[%s2006_s3 + $0x48] sm:$0xff] }
 0x163   :  { %v1854_v61 = vpop.f32.mrf.mxu0  ;;  %v1857_v60 = vpop.f32.mrf.mxu1  ;;  %v772_v2 = vmax.f32 %v668_v5, %v751_v45  ;;  %v771_v58 = vmax.f32 %v1827_v40, %v750_v38 }
 0x164   :  { %871 = vmatpush1.msra.mxu1 %v782_v17  ;;  %v769_v20 = vmax.f32 %v1821_v28, %v748_v8 }
 0x165   :  { %v559_v10 = vpop.f32.mrf.mxu0  ;;  %872 = vmatprep.subr.mxu1 %v1532_v0  ;;  %v734_v23 = vpop.f32.mrf.mxu1 }
 0x166   :  { %873 = vmatpush1.msra.mxu1 %v781_v21  ;;  %v321_v14 = vpop.permute.xlu1 %320  ;;  %v316_v10 = vpop.permute.xlu0 %315 }
 0x167   :  { %v562_v24 = vpop.f32.mrf.mxu0  ;;  %874 = vmatprep.subr.mxu1 %v1532_v0  ;;  %v737_v26 = vpop.f32.mrf.mxu1  ;;  %v558_v40 = vadd.f32 %v1854_v61, %v321_v14  ;;  %v553_v34 = vadd.f32 %v1848_v59, %v316_v10 }
 0x168   :  { %875 = vmatpush1.msra.mxu1 %v780_v15  ;;  %v563_v17 = vadd.f32 %v562_v24, %v326_v4  ;;  %v767_v15 = vmax.f32 %v1817_v16, %v746_v19 }
 0x169   :  { %v564_v27 = vpop.f32.mrf.mxu0  ;;  %876 = vmatprep.subr.mxu1 %v1532_v0  ;;  %v739_v30 = vpop.f32.mrf.mxu1  ;;  %v728_v28 = vadd.f32 %v1851_v9, %v558_v40  ;;  %v723_v23 = vadd.f32 %v1845_v44, %v553_v34 }
 0x16a   :  { %877 = vmatpush1.msra.mxu1 %v779_v25  ;;  %v733_v6 = vadd.f32 %v1857_v60, %v563_v17  ;;  %v790_v25 = vld [vmem:[%s2006_s3 + $0x10] sm:$0xff]  ;;  %v792_v27 = vld [vmem:[%s2006_s3 + $0x20] sm:$0xff]  ;;  %v799_v30 = vld [vmem:[%s2006_s3 + $0x58] sm:$0xff] }
 0x16b   :  { %v567_v31 = vpop.f32.mrf.mxu0  ;;  %878 = vmatprep.subr.mxu1 %v1532_v0  ;;  %v742_v32 = vpop.f32.mrf.mxu1  ;;  %v763_v59 = vmul.f32 0.2, %v728_v28  ;;  %v762_v16 = vmul.f32 0.2, %v723_v23 }
 0x16c   :  { %879 = vmatpush1.msra.mxu1 %v778_v29  ;;  %v568_v57 = vadd.f32 %v567_v31, %v331_v52  ;;  %v764_v22 = vmul.f32 0.2, %v733_v6  ;;  %v796_v29 = vld [vmem:[%s2006_s3 + $0x40] sm:$0xff]  ;;  %v798_v31 = vld [vmem:[%s2006_s3 + $0x50] sm:$0xff] }
 0x16d   :  { %v569_v33 = vpop.f32.mrf.mxu0  ;;  %880 = vmatprep.subr.mxu1 %v1532_v0  ;;  %v744_v35 = vpop.f32.mrf.mxu1  ;;  %v784_v9 = vmax.f32 %v728_v28, %v763_v59  ;;  %v783_v44 = vmax.f32 %v723_v23, %v762_v16  ;;  %v986_v59 = vld [vmem:[%s2008_s5 + $0x10] sm:$0xff] }
 0x16e   :  { %881 = vmatpush1.msra.mxu1 %v777_v51  ;;  %v738_v21 = vadd.f32 %v737_v26, %v568_v57  ;;  %v785_v62 = vmax.f32 %v733_v6, %v764_v22  ;;  %v793_v26 = vld [vmem:[%s2006_s3 + $0x28] sm:$0xff]  ;;  %v984_v22 = vld [vmem:[%s2008_s5] sm:$0xff] }
 0x16f   :  { %v572_v36 = vpop.f32.mrf.mxu0  ;;  %882 = vmatprep.subr.mxu1 %v1532_v0 }
 0x170   :  { %883 = vmatpush1.msra.mxu1 %v776_v47  ;;  %v573_v56 = vadd.f32 %v572_v36, %v336_v43  ;;  %v765_v61 = vmul.f32 0.2, %v738_v21  ;;  %v842_v36 = vpop.permute.xlu1 %841  ;;  %v837_v43 = vpop.permute.xlu0 %836 }
 0x171   :  { %884 = vmatprep.subr.mxu1 %v1532_v0  ;;  %v574_v41 = vpop.f32.mrf.mxu0 }
 0x172   :  { %885 = vmatpush1.msra.mxu1 %v775_v39  ;;  %v743_v18 = vadd.f32 %v742_v32, %v573_v56  ;;  %v786_v60 = vmax.f32 %v738_v21, %v765_v61 }
 0x173   :  { %886 = vmatprep.subr.mxu1 %v1532_v0 }
 0x174   :  { %887 = vmatpush1.msra.mxu1 %v774_v48  ;;  %v766_v11 = vmul.f32 0.2, %v743_v18  ;;  %v832_v45 = vpop.permute.xlu1 %831  ;;  %v827_v52 = vpop.permute.xlu0 %826 }
 0x175   :  { %888 = vmatprep.subr.mxu1 %v1532_v0 }
 0x176   :  { %889 = vmatpush1.msra.mxu1 %v773_v49  ;;  %v787_v24 = vmax.f32 %v743_v18, %v766_v11 }
 0x177   :  { %890 = vmatprep.subr.mxu1 %v1532_v0 }
 0x178   :  { %891 = vmatpush1.msra.mxu1 %v772_v2  ;;  %v822_v4 = vpop.permute.xlu1 %821  ;;  %v817_v14 = vpop.permute.xlu0 %816 }
 0x179   :  { %892 = vmatprep.subr.mxu1 %v1532_v0 }
 0x17a   :  { %893 = vmatpush1.msra.mxu1 %v771_v58 }
 0x17b   :  { %894 = vmatprep.subr.mxu1 %v1532_v0 }
 0x17c   :  { %895 = vmatpush1.msra.mxu1 %v770_v13  ;;  %v812_v21 = vpop.permute.xlu1 %811  ;;  %v1003_v16 = vpop.permute.xlu0 %1002 }
 0x17d   :  { %896 = vmatprep.subr.mxu1 %v1532_v0 }
 0x17e   :  { %897 = vmatpush1.msra.mxu1 %v769_v20 }
 0x17f   :  { %898 = vmatprep.subr.mxu1 %v1532_v0 }
 0x180   :  { %899 = vmatpush1.msra.mxu1 %v768_v63 }
 0x181   :  { %900 = vmatprep.subr.mxu1 %v1532_v0 }
 0x182   :  { %901 = vmatpush1.msra.mxu1 %v767_v15 }
 0x183   :  { %924 = vmatprep.subr.mxu1 %v1532_v0 }
 0x184   :  { %1361 = vmatpush2.msk.msra.mxu1 %vm866_vm3, %v787_v24  ;;  %v985_v24 = vld [vmem:[%s2008_s5 + $0x8] sm:$0xff] }
 0x185   :  { %926 = vmatprep.subr.mxu1 %v1532_v0 }
 0x186   :  { %927 = vmatpush2.msra.mxu1 %v786_v60 }
 0x187   :  { %928 = vmatprep.subr.mxu1 %v1532_v0 }
 0x188   :  { %929 = vmatpush2.msra.mxu1 %v785_v62 }
 0x189   :  { %930 = vmatprep.subr.mxu1 %v1532_v0 }
 0x18a   :  { %931 = vmatpush2.msra.mxu1 %v784_v9 }
 0x18b   :  { %932 = vmatprep.subr.mxu1 %v1532_v0 }
 0x18c   :  { %933 = vmatpush2.msra.mxu1 %v783_v44  ;;  %v998_v44 = vpop.permute.xlu1 %997 }
 0x18d   :  { %935 = vmatmul.mubr.f32.vlgmr.msra.gmra.mxu1 %v788_v54  ;;  %1435 = vmatprep.subr.mxu1 %v1532_v0 }
 0x18e   :  { %1363 = vmatprep.mubr.msk.f32.mxu1 %vm844_vm2, %v791_v7 }
 0x191   :  { %940 = vmatmul.mubr.f32.gmra.mxu1 %v790_v25  ;;  %v993_v25 = vpop.permute.xlu0 %992 }
 0x192   :  { %1364 = vmatprep.mubr.msk.f32.mxu1 %vm844_vm2, %v793_v26 }
 0x195   :  { %945 = vmatmul.mubr.f32.gmra.mxu1 %v792_v27 }
 0x196   :  { %1365 = vmatprep.mubr.msk.f32.mxu1 %vm844_vm2, %v795_v3 }
 0x199   :  { %950 = vmatmul.mubr.f32.gmra.mxu1 %v794_v50 }
 0x19a   :  { %1366 = vmatprep.mubr.msk.f32.mxu1 %vm844_vm2, %v797_v55 }
 0x19d   :  { %955 = vmatmul.mubr.f32.gmra.mxu1 %v796_v29 }
 0x19e   :  { %1367 = vmatprep.mubr.msk.f32.mxu1 %vm844_vm2, %v799_v30 }
 0x1a1   :  { %960 = vmatmul.mubr.f32.gmra.mxu1 %v798_v31 }
 0x1a2   :  { %1368 = vmatprep.mubr.msk.f32.mxu1 %vm844_vm2, %v801_v1 }
 0x1a5   :  { %965 = vmatmul.mubr.f32.gmra.mxu1 %v800_v46 }
 0x1a6   :  { %1441 = vmatprep.mubr.msk.f32.mxu1 %vm1534_vm4, %v1532_v0 }
 0x24d   :  { %v936_v51 = vpop.f32.mrf.mxu1 }
 0x24e   :  { %v937_v10 = vadd.f32 %v936_v51, %v812_v21  ;;  %v1105_v51 = vld [vmem:[%s2010_s7] sm:$0xff] }
 0x24f   :  { %v938_v32 = vpop.f32.mrf.mxu1 }
 0x250   :  { %v970_v15 = vmul.f32 0.2, %v937_v10  ;;  %v1106_v32 = vld [vmem:[%s2010_s7 + $0x8] sm:$0xff] }
 0x251   :  { %v941_v33 = vpop.f32.mrf.mxu1 }
 0x252   :  { %v942_v19 = vadd.f32 %v941_v33, %v817_v14  ;;  %v977_v23 = vmax.f32 %v937_v10, %v970_v15  ;;  %v1107_v33 = vld [vmem:[%s2010_s7 + $0x10] sm:$0xff] }
 0x253   :  { %v943_v5 = vpop.f32.mrf.mxu1 }
 0x254   :  { %v971_v6 = vmul.f32 0.2, %v942_v19 }
 0x255   :  { %v946_v42 = vpop.f32.mrf.mxu1 }
 0x256   :  { %v947_v13 = vadd.f32 %v946_v42, %v822_v4  ;;  %v978_v61 = vmax.f32 %v942_v19, %v971_v6  ;;  %v1124_v42 = vpop.permute.xlu1 %1123 }
 0x257   :  { %v948_v47 = vpop.f32.mrf.mxu1 }
 0x258   :  { %v972_v63 = vmul.f32 0.2, %v947_v13 }
 0x259   :  { %v951_v35 = vpop.f32.mrf.mxu1 }
 0x25a   :  { %v952_v58 = vadd.f32 %v951_v35, %v827_v52  ;;  %v979_v28 = vmax.f32 %v947_v13, %v972_v63 }
 0x25b   :  { %v953_v37 = vpop.f32.mrf.mxu1 }
 0x25c   :  { %v973_v20 = vmul.f32 0.2, %v952_v58 }
 0x25d   :  { %v956_v39 = vpop.f32.mrf.mxu1 }
 0x25e   :  { %v957_v2 = vadd.f32 %v956_v39, %v832_v45  ;;  %v980_v11 = vmax.f32 %v952_v58, %v973_v20 }
 0x25f   :  { %v958_v41 = vpop.f32.mrf.mxu1 }
 0x260   :  { %v974_v17 = vmul.f32 0.2, %v957_v2 }
 0x261   :  { %v961_v48 = vpop.f32.mrf.mxu1 }
 0x262   :  { %v962_v49 = vadd.f32 %v961_v48, %v837_v43  ;;  %v981_v34 = vmax.f32 %v957_v2, %v974_v17  ;;  %v1114_v43 = vpop.permute.xlu1 %1113 }
 0x263   :  { %v963_v38 = vpop.f32.mrf.mxu1 }
 0x264   :  { %v975_v57 = vmul.f32 0.2, %v962_v49 }
 0x265   :  { %v966_v53 = vpop.f32.mrf.mxu1 }
 0x266   :  { %v967_v56 = vadd.f32 %v966_v53, %v842_v36  ;;  %v982_v40 = vmax.f32 %v962_v49, %v975_v57  ;;  %v1119_v36 = vpop.permute.xlu0 %1118 }
 0x267   :  { %v968_v8 = vpop.f32.mrf.mxu1 }
 0x268   :  { %v976_v12 = vmul.f32 0.2, %v967_v56  ;;  %v1222_v8 = vld [vmem:[%s2012_s9] sm:$0x3f]  ;;  %s1535_s9 = smov [#allocation7]  }
 0x269   :  { %s1329_s24 = sshll.u32 %s1535_s9, 4  ;;  %s1330_s24 = int_to_ptr.vmem [resolvable:$true] %s1329_s24 }
 0x26a   :  { %v983_v18 = vmax.f32 %v967_v56, %v976_v12  ;;  %v1227_v58 = vpop.permute.xlu0 %1226  ;;  %s1500_s25 = scalar_lea.vmem %s1330_s24, 128  ;;  %p1505_p11 = scmp.lt.s32.totalorder %s1330_s24, %s1330_s24 }
 0x26b   :  { %p1501_p10 = scmp.ne.s32.totalorder %s1330_s24, %s1500_s25  ;;  %p1506_p12 = scmp.lt.s32.totalorder %s1500_s25, %s1500_s25 }
 0x26c   :  { %1398 = vmatpush3.msk.msra.mxu0 %vm1015_vm5, %v983_v18 }
 0x26d   :  { %1399 = vmatprep.subr.mxu0 %v1532_v0  ;;  %p1507_p13 = por %p1506_p12, %p1505_p11 }
 0x26e   :  { %1400 = vmatpush3.msra.mxu0 %v982_v40 }
 0x26f   :  { %1401 = vmatprep.subr.mxu0 %v1532_v0  ;;  %p1508_p0 = pnand %p1507_p13, %p1501_p10 }
 0x270   :  { %1402 = vmatpush3.msra.mxu0 %v981_v34 }
 0x271   :  { %1403 = vmatprep.subr.mxu0 %v1532_v0 }
 0x272   :  { %1404 = vmatpush3.msra.mxu0 %v980_v11 }
 0x273   :  { %1405 = vmatprep.subr.mxu0 %v1532_v0 }
 0x274   :  { %1406 = vmatpush3.msra.mxu0 %v979_v28 }
 0x275   :  { %1407 = vmatprep.subr.mxu0 %v1532_v0 }
 0x276   :  { %1408 = vmatpush3.msra.mxu0 %v978_v61 }
 0x277   :  { %1409 = vmatprep.subr.mxu0 %v1532_v0 }
 0x278   :  { %1410 = vmatpush3.msra.mxu0 %v977_v23 }
 0x279   :  { %1412 = vmatmul.mubr.msk.f32.vlgmr.msra.gmra.mxu0 %vm1005_vm6, %v984_v22  ;;  %1420 = vmatprep.subr.mxu0 %v1532_v0 }
 0x27a   :  { %1414 = vmatprep.mubr.msk.f32.mxu0 %vm1534_vm4, %v1532_v0 }
 0x27d   :  { %1415 = vmatmul.mubr.msk.f32.gmra.mxu0 %vm1005_vm6, %v985_v24 }
 0x27e   :  { %1417 = vmatprep.mubr.msk.f32.mxu0 %vm1534_vm4, %v1532_v0 }
 0x281   :  { %1418 = vmatmul.mubr.msk.f32.gmra.mxu0 %vm1005_vm6, %v986_v59 }
 0x282   :  { %1426 = vmatprep.mubr.msk.f32.mxu0 %vm1534_vm4, %v1532_v0 }
 0x339   :  { %v1085_v60 = vpop.f32.mrf.mxu0 }
 0x33a   :  { %v1086_v27 = vadd.f32 %v1085_v60, %v993_v25 }
 0x33b   :  { %v1413_v62 = vpop.f32.mrf.mxu0 }
 0x33c   :  { %v1099_v30 = vmul.f32 0.2, %v1086_v27 }
 0x33d   :  { %v1090_v9 = vpop.f32.mrf.mxu0 }
 0x33e   :  { %v1091_v7 = vadd.f32 %v1090_v9, %v998_v44  ;;  %v1102_v46 = vmax.f32 %v1086_v27, %v1099_v30 }
 0x33f   :  { %v1416_v54 = vpop.f32.mrf.mxu0 }
 0x340   :  { %v1100_v55 = vmul.f32 0.2, %v1091_v7 }
 0x341   :  { %v1095_v26 = vpop.f32.mrf.mxu0 }
 0x342   :  { %v1096_v3 = vadd.f32 %v1095_v26, %v1003_v16  ;;  %v1103_v1 = vmax.f32 %v1091_v7, %v1100_v55 }
 0x343   :  { %v1419_v50 = vpop.f32.mrf.mxu0 }
 0x344   :  { %v1101_v29 = vmul.f32 0.2, %v1096_v3 }
 0x346   :  { %v1104_v31 = vmax.f32 %v1096_v3, %v1101_v29 }
 0x348   :  { %1421 = vmatpush3.msra.mxu0 %v1104_v31 }
 0x349   :  { %1422 = vmatprep.subr.mxu0 %v1532_v0 }
 0x34a   :  { %1423 = vmatpush3.msra.mxu0 %v1103_v1 }
 0x34b   :  { %1424 = vmatprep.subr.mxu0 %v1532_v0 }
 0x34c   :  { %1425 = vmatpush3.msra.mxu0 %v1102_v46 }
 0x34d   :  { %1427 = vmatmul.mubr.msk.f32.vlgmr.msra.gmra.mxu0 %vm1126_vm7, %v1105_v51 }
 0x34e   :  { %1429 = vmatprep.mubr.msk.f32.mxu0 %vm1534_vm4, %v1532_v0 }
 0x351   :  { %1430 = vmatmul.mubr.msk.f32.gmra.mxu0 %vm1126_vm7, %v1106_v32 }
 0x352   :  { %1432 = vmatprep.mubr.msk.f32.mxu0 %vm1534_vm4, %v1532_v0 }
 0x355   :  { %1433 = vmatmul.mubr.msk.f32.gmra.mxu0 %vm1126_vm7, %v1107_v33 }
 0x40d   :  { %v1202_v5 = vpop.f32.mrf.mxu0 }
 0x40e   :  { %v1203_v45 = vadd.f32 %v1202_v5, %v1114_v43 }
 0x40f   :  { %v1428_v47 = vpop.f32.mrf.mxu0 }
 0x410   :  { %v1216_v53 = vmul.f32 0.2, %v1203_v45 }
 0x411   :  { %v1207_v35 = vpop.f32.mrf.mxu0 }
 0x412   :  { %v1208_v39 = vadd.f32 %v1207_v35, %v1119_v36  ;;  %v1219_v4 = vmax.f32 %v1203_v45, %v1216_v53 }
 0x413   :  { %v1431_v37 = vpop.f32.mrf.mxu0 }
 0x414   :  { %v1217_v49 = vmul.f32 0.2, %v1208_v39 }
 0x415   :  { %v1212_v41 = vpop.f32.mrf.mxu0 }
 0x416   :  { %v1213_v48 = vadd.f32 %v1212_v41, %v1124_v42  ;;  %v1220_v56 = vmax.f32 %v1208_v39, %v1217_v49 }
 0x417   :  { %v1434_v38 = vpop.f32.mrf.mxu0 }
 0x418   :  { %v1218_v52 = vmul.f32 0.2, %v1213_v48 }
 0x41a   :  { %v1221_v2 = vmax.f32 %v1213_v48, %v1218_v52 }
 0x41c   :  { %1436 = vmatpush3.msra.mxu1 %v1221_v2 }
 0x41d   :  { %1437 = vmatprep.subr.mxu1 %v1532_v0 }
 0x41e   :  { %1438 = vmatpush3.msra.mxu1 %v1220_v56 }
 0x41f   :  { %1439 = vmatprep.subr.mxu1 %v1532_v0 }
 0x420   :  { %1440 = vmatpush3.msra.mxu1 %v1219_v4 }
 0x421   :  { %1442 = vmatmul.mubr.msk.f32.vlgmr.msra.gmra.mxu1 %vm1126_vm7, %v1222_v8 }
 0x4e1   :  { %v1298_v57 = vpop.f32.mrf.mxu1 }
 0x4e2   :  { %v1299_v12 = vadd.f32 %v1298_v57, %v1227_v58 }
 0x4e3   :  { %v1443_v13 = vpop.f32.mrf.mxu1 }
 0x4e4   :  { %v1303_v17 = vsel %vm1302_vm8, %v1299_v12, -inf }
 0x4e5   :  { %v1304_v18 = vrot.slane %v1303_v17, 4 }
 0x4e7   :  { %v1305_v14 = vmax.f32 %v1303_v17, %v1304_v18 }
 0x4e9   :  { %v1306_v19 = vrot.slane %v1305_v14, 2 }
 0x4eb   :  { %v1307_v20 = vmax.f32 %v1305_v14, %v1306_v19 }
 0x4ed   :  { %v1308_v40 = vrot.slane %v1307_v20, 1 }
 0x4ef   :  { %v1309_v21 = vmax.f32 %v1307_v20, %v1308_v40 }
 0x4f1   :  { %v1310_v10 = vsub.f32 %v1299_v12, %v1309_v21 }
 0x4f3   :  { %v1311_v63 = vmul.f32 1.442695, %v1310_v10 }
 0x4f5   :  { %1456 = vpow2.f32 %v1311_v63 }
 0x502   :  { %v1457_v34 = vpop.eup %1456 }
 0x503   :  { %v1313_v0 = vsel %vm1302_vm8, %v1457_v34, 0.0 }
 0x504   :  { %v1314_v6 = vrot.slane %v1313_v0, 4 }
 0x506   :  { %v1315_v11 = vadd.f32 %v1314_v6, %v1313_v0 }
 0x508   :  { %v1316_v15 = vrot.slane %v1315_v11, 2 }
 0x50a   :  { %v1317_v28 = vadd.f32 %v1316_v15, %v1315_v11 }
 0x50c   :  { %v1318_v61 = vrot.slane %v1317_v28, 1 }
 0x50e   :  { %v1319_v23 = vadd.f32 %v1318_v61, %v1317_v28 }
 0x510   :  { %1458 = vrcp.f32 %v1319_v23 }
 0x51d   :  { %v1459_v22 = vpop.eup %1458 }
 0x51e   :  { %v1321_v24 = vmul.f32 %v1459_v22, %v1457_v34 }
 0x520   :  { %1322 = vst [vmem:[#allocation7] sm:$0x3f] %v1321_v24 }
 0x521   :  { %1511 = shalt.err (!%p1508_p0)
}
 0x522   :  { %1332 = dma.vmem_to_hbm [thread:$0]  %s1330_s24, 128, %s2014_s11, [#allocation4]  }
 0x523   :  { %1524 = dma.done.wait [#allocation4], 128  }
 0x524   :  { %1525 = vsyncadd [#allocation4], 4294967168 }
 0x525   :  { %1336 = vsyncpa [#allocation3], 1 }
 0x526   :  { %1337 = vsyncpa [#allocation6], 1 }
 0x527   :  { %1338 = vsyncpa [#allocation4], 1 }

</bundles_post_ra>
